<compile_context>
chip_gen: v7x
topology: tpu7x:2x2x1
jax: 0.10.0
libtpu: 0.0.40
codegen_flags: <defaults>
</compile_context>

<pallas_src>
import functools

import jax
import jax.numpy as jnp
from jax import lax
from jax.experimental import pallas as pl
from jax.experimental.pallas import tpu as pltpu

NBINS = 256              # intensity bins, as in the reference histogram matching
_LANE = 128
_DEFAULT_CHUNK = 2048    # pixels per grid step (multiple of 128)
_CHUNK_KERNEL_VMEM = 48 << 20   # generous explicit cap; actual use is O(chunk)


def _pick_chunk(hw, target=_DEFAULT_CHUNK):
    assert hw % _LANE == 0, "H*W must be a multiple of 128"
    c = min(target, hw)
    while hw % c != 0:
        c -= _LANE
    return c


def _device_kind():
    try:
        return jax.devices()[0].device_kind.lower()
    except Exception:
        return ""


def _onehot_dtype():
    # bf16 one-hots (exact: bins & floored pixel values are integers <= 255)
    # halve the dominant VALU compare work on v6e/v7x; v5e has no bf16 VALU.
    kind = _device_kind()
    if "v5 lite" in kind or "v5lite" in kind or "v5e" in kind:
        return jnp.float32
    return jnp.bfloat16


def _vmem_limit(bytes_needed):
    kind = _device_kind()
    cap = (56 << 20) if "v7" in kind else (100 << 20)
    return int(min(max(bytes_needed, 32 << 20), cap))


def _quantize(x):
    # de_norm(x) * 255, truncated to integer bins in [0, 255]
    dn = jnp.clip((x + 1.0) * 0.5, 0.0, 1.0) * 255.0
    return jnp.clip(jnp.floor(dn), 0.0, 255.0)


# -----------------------------------------------------------------------------
# Kernel 1: mask preparation (eye dilation, eye blur, stacked 4-region layout)
# -----------------------------------------------------------------------------
def _mask_prep_kernel(ms_ref, mr_ref, ms4_ref, mr4_ref, blur_ref, *, margin):
    f32 = jnp.float32
    _, H, W = ms_ref.shape
    row = lax.broadcasted_iota(jnp.int32, (H, W), 0)
    col = lax.broadcasted_iota(jnp.int32, (H, W), 1)

    def shift2d(x, s, axis):
        """Zero-padded shift of an (H, W) map by s along `axis` (XLU roll + mask)."""
        if s == 0:
            return x
        n = H if axis == 0 else W
        idx = row if axis == 0 else col
        y = pltpu.roll(x, shift=s % n, axis=axis)
        if s > 0:
            return jnp.where(idx >= s, y, 0.0)
        return jnp.where(idx < n + s, y, 0.0)

    def box_max(x, m):               # separable (2m+1)^2 dilation, zero padded
        acc = x
        for s in range(1, m + 1):
            acc = jnp.maximum(acc, jnp.maximum(shift2d(x, s, 0), shift2d(x, -s, 0)))
        out = acc
        for s in range(1, m + 1):
            out = jnp.maximum(out, jnp.maximum(shift2d(acc, s, 1), shift2d(acc, -s, 1)))
        return out

    def box_sum(x, m):               # separable (2m+1)^2 box sum, zero padded
        acc = x
        for s in range(1, m + 1):
            acc = acc + shift2d(x, s, 0) + shift2d(x, -s, 0)
        out = acc
        for s in range(1, m + 1):
            out = out + shift2d(acc, s, 1) + shift2d(acc, -s, 1)
        return out

    def stacked(mref, out4):
        m = mref[...]                # (5, H, W)
        # TODO(synk): exact `expand_area` reference is not provided; implemented as
        # a (2*margin+1)^2 binary box dilation (zero padding) intersected with skin.
        eye = box_max(m[2] + m[3], margin)
        eye = (eye > 0.0).astype(f32) * m[1]
        out4[0] = m[1]               # skin
        out4[1] = m[4]               # neck
        out4[2] = m[0]               # lip
        out4[3] = eye                # dilated eye region
        return eye

    eye_s = stacked(ms_ref, ms4_ref)
    stacked(mr_ref, mr4_ref)
    # TODO(synk): exact `mask_blur` reference is not provided; implemented as a 5x5
    # zero-padded box blur restricted to the mask support ('valid' mode).
    blur_ref[0] = box_sum(eye_s, 2) * (1.0 / 25.0) * eye_s


def _prepare_masks(mask_srcs, mask_tars, margin):
    B, Cm, H, W = mask_srcs.shape
    kern = functools.partial(_mask_prep_kernel, margin=margin)
    spec_in = pl.BlockSpec((None, Cm, H, W), lambda b: (b, 0, 0, 0))
    spec4 = pl.BlockSpec((None, 4, H, W), lambda b: (b, 0, 0, 0))
    spec1 = pl.BlockSpec((None, 1, H, W), lambda b: (b, 0, 0, 0))
    per_img = (2 * Cm + 2 * 4 + 1) * H * W * 4
    vmem_limit = _vmem_limit(2 * per_img + 8 * H * W * 4 + (4 << 20))
    return pl.pallas_call(
        kern,
        out_shape=(jax.ShapeDtypeStruct((B, 4, H, W), jnp.float32),
                   jax.ShapeDtypeStruct((B, 4, H, W), jnp.float32),
                   jax.ShapeDtypeStruct((B, 1, H, W), jnp.float32)),
        grid=(B,),
        in_specs=[spec_in, spec_in],
        out_specs=(spec4, spec4, spec1),
        compiler_params=pltpu.CompilerParams(
            dimension_semantics=("parallel",),
            vmem_limit_bytes=vmem_limit),
    )(mask_srcs, mask_tars)


# -----------------------------------------------------------------------------
# Kernel 2: masked per-region histograms (chunked) + transfer-LUT build
# -----------------------------------------------------------------------------
def _hist_lut_kernel(flags_ref, src_ref, tgt_ref, ms_ref, mr_ref,
                     tables_ref, hist_s_ref, hist_r_ref, *, oh_dtype):
    f32 = jnp.float32
    C = src_ref.shape[0]             # 3 colour channels
    R = ms_ref.shape[0]              # 4 regions: skin, neck, lip, eye
    NB = NBINS
    b = pl.program_id(0)
    k = pl.program_id(1)

    @pl.when(k == 0)
    def _():
        hist_s_ref[...] = jnp.zeros_like(hist_s_ref)
        hist_r_ref[...] = jnp.zeros_like(hist_r_ref)

    flag = flags_ref[b, k]

    @pl.when(flag != 0)                      # skip mask-empty pixel chunks
    def _():
        bins = lax.broadcasted_iota(f32, (NB, 1), 0).astype(oh_dtype)
        contract_last = (((1,), (1,)), ((), ()))
        q_s = _quantize(src_ref[...]).astype(oh_dtype)   # (C, P) exact ints
        q_r = _quantize(tgt_ref[...]).astype(oh_dtype)
        m_s = ms_ref[...].astype(oh_dtype)               # (R, P) 0/1
        m_r = mr_ref[...].astype(oh_dtype)
        for c in range(C):
            oh_s = (q_s[c:c + 1, :] == bins).astype(oh_dtype)   # (NB, P)
            oh_r = (q_r[c:c + 1, :] == bins).astype(oh_dtype)
            cnt_s = lax.dot_general(m_s, oh_s, contract_last,
                                    preferred_element_type=f32)  # (R, NB)
            cnt_r = lax.dot_general(m_r, oh_r, contract_last,
                                    preferred_element_type=f32)
            hist_s_ref[c] = hist_s_ref[c] + cnt_s
            hist_r_ref[c] = hist_r_ref[c] + cnt_r

    @pl.when(k == pl.num_programs(1) - 1)
    def _():
        # Build the 12 transfer LUTs (cal_trans recurrence), vectorized over R.
        bi = lax.broadcasted_iota(jnp.int32, (NB, NB), 0)
        bj = lax.broadcasted_iota(jnp.int32, (NB, NB), 1)
        upper = (bi <= bj).astype(f32)               # upper[b, j] = (b <= j)
        col_j = lax.broadcasted_iota(f32, (1, 1, NB), 2)
        row_i = lax.broadcasted_iota(f32, (1, NB), 1)
        for c in range(C):
            h_s = hist_s_ref[c]                      # (R, NB)
            h_r = hist_r_ref[c]
            cum_s = jnp.dot(h_s, upper, preferred_element_type=f32)   # (R, NB)
            cum_r = jnp.dot(h_r, upper, preferred_element_type=f32)
            cdf_s = cum_s / jnp.maximum(cum_s[:, NB - 1:NB], 1.0)
            cdf_r = cum_r / jnp.maximum(cum_r[:, NB - 1:NB], 1.0)
            cdf_r_prev = pltpu.roll(cdf_r, shift=1, axis=1)   # col 0 unused (j>=1)
            cs = cdf_s[:, :, None]                   # (R, NB_i, 1)
            cr = cdf_r[:, None, :]                   # (R, 1, NB_j)
            crp = cdf_r_prev[:, None, :]
            # smallest j >= 1 with cdf_r[j-1] <= cdf_s[i] <= cdf_r[j]
            cond = (crp <= cs) & (cs <= cr) & (col_j >= 1.0)
            cand = jnp.where(cond, col_j, 1e9)
            min_j = jnp.min(cand, axis=2)            # (R, NB)
            tcol = jnp.where(min_j < 1e9, min_j, row_i)   # identity fallback
            tcol = jnp.where(row_i == 0.0, 0.0, tcol)
            tcol = jnp.where(row_i == float(NB - 1), float(NB - 1), tcol)
            tables_ref[c] = tcol                     # (R, NB)


def _hist_tables(flags, src, tgt, ms, mr, *, chunk, oh_dtype):
    B, C, HW = src.shape
    R = ms.shape[1]
    n_chunks = HW // chunk
    kern = functools.partial(_hist_lut_kernel, oh_dtype=oh_dtype)
    img_spec = pl.BlockSpec((None, C, chunk), lambda b, k, flags: (b, 0, k))
    msk_spec = pl.BlockSpec((None, R, chunk), lambda b, k, flags: (b, 0, k))
    tbl_spec = pl.BlockSpec((None, C, R, NBINS), lambda b, k, flags: (b, 0, 0, 0))
    gs = pltpu.PrefetchScalarGridSpec(
        num_scalar_prefetch=1,
        grid=(B, n_chunks),
        in_specs=[img_spec, img_spec, msk_spec, msk_spec],
        out_specs=tbl_spec,
        scratch_shapes=[pltpu.VMEM((C, R, NBINS), jnp.float32),
                        pltpu.VMEM((C, R, NBINS), jnp.float32)])
    return pl.pallas_call(
        kern,
        out_shape=jax.ShapeDtypeStruct((B, C, R, NBINS), jnp.float32),
        grid_spec=gs,
        compiler_params=pltpu.CompilerParams(
            dimension_semantics=("parallel", "arbitrary"),
            vmem_limit_bytes=_CHUNK_KERNEL_VMEM),
    )(flags, src, tgt, ms, mr)


# -----------------------------------------------------------------------------
# Kernel 3: apply the transfer LUTs and blend the four regions (chunked)
# -----------------------------------------------------------------------------
def _apply_blend_kernel(flags_ref, tables_ref, src_ref, ms_ref, blur_ref,
                        out_ref, *, oh_dtype):
    f32 = jnp.float32
    C = src_ref.shape[0]
    R = ms_ref.shape[0]
    NB = NBINS
    b = pl.program_id(0)
    k = pl.program_id(1)
    flag = flags_ref[b, k]

    @pl.when(flag == 0)                      # no source mask in this chunk
    def _():
        out_ref[...] = src_ref[...]

    @pl.when(flag != 0)
    def _():
        bins = lax.broadcasted_iota(f32, (NB, 1), 0).astype(oh_dtype)
        s = src_ref[...]                     # (C, P)
        ms = ms_ref[...]                     # (R, P)
        blur = blur_ref[...]                 # (1, P)
        q = _quantize(s).astype(oh_dtype)
        scale = jnp.float32(2.0 / 255.0)
        for c in range(C):
            oh = (q[c:c + 1, :] == bins).astype(oh_dtype)          # (NB, P)
            tb = tables_ref[c].astype(oh_dtype)                    # (R, NB)
            matched = jnp.dot(tb, oh, preferred_element_type=f32)  # (R, P)
            row = s[c:c + 1, :]
            for r in range(R):
                hm = ms[r:r + 1, :]                 # histogram/source mask
                bm = hm if r < R - 1 else blur      # eye uses blurred mask
                mn = hm * matched[r:r + 1, :] * scale - 1.0   # norm(m*match/255)
                row = (1.0 - bm) * row + bm * mn
            out_ref[c:c + 1, :] = row


def _apply_blend(flags, tables, src, ms, blur, *, chunk, oh_dtype):
    B, C, HW = src.shape
    R = ms.shape[1]
    n_chunks = HW // chunk
    kern = functools.partial(_apply_blend_kernel, oh_dtype=oh_dtype)
    tbl_spec = pl.BlockSpec((None, C, R, NBINS), lambda b, k, flags: (b, 0, 0, 0))
    img_spec = pl.BlockSpec((None, C, chunk), lambda b, k, flags: (b, 0, k))
    msk_spec = pl.BlockSpec((None, R, chunk), lambda b, k, flags: (b, 0, k))
    blr_spec = pl.BlockSpec((None, 1, chunk), lambda b, k, flags: (b, 0, k))
    gs = pltpu.PrefetchScalarGridSpec(
        num_scalar_prefetch=1,
        grid=(B, n_chunks),
        in_specs=[tbl_spec, img_spec, msk_spec, blr_spec],
        out_specs=img_spec)
    return pl.pallas_call(
        kern,
        out_shape=jax.ShapeDtypeStruct((B, C, HW), jnp.float32),
        grid_spec=gs,
        compiler_params=pltpu.CompilerParams(
            dimension_semantics=("parallel", "parallel"),
            vmem_limit_bytes=_CHUNK_KERNEL_VMEM),
    )(flags, tables, src, ms, blur)


# -----------------------------------------------------------------------------
# Module-level composition (mirrors ComposePGT.forward / generate_pgt)
# -----------------------------------------------------------------------------
def compose_pgt(sources, targets, mask_srcs, mask_tars, lms_srcs, lms_tars,
                margins, blend_alphas):
    B, C, H, W = sources.shape
    HW = H * W
    oh_dtype = _onehot_dtype()

    mask_srcs = mask_srcs.astype(jnp.float32)
    mask_tars = mask_tars.astype(jnp.float32)

    # Stacked 4-region masks [skin, neck, lip, eye] + blurred eye mask.
    m_s4, m_r4, blur_s = _prepare_masks(mask_srcs, mask_tars, margins['eye'])

    src_f = sources.reshape(B, C, HW).astype(jnp.float32)
    tgt_f = targets.reshape(B, C, HW).astype(jnp.float32)
    ms4 = m_s4.reshape(B, 4, HW)
    mr4 = m_r4.reshape(B, 4, HW)
    blur = blur_s.reshape(B, 1, HW)

    chunk = _pick_chunk(HW)
    n_chunks = HW // chunk

    # Per-(batch, chunk) skip flags (scalar-prefetched into SMEM).
    ms_any = jnp.max(ms4.reshape(B, 4, n_chunks, chunk), axis=(1, 3)) > 0.0
    mr_any = jnp.max(mr4.reshape(B, 4, n_chunks, chunk), axis=(1, 3)) > 0.0
    flags_hist = jnp.logical_or(ms_any, mr_any).astype(jnp.int32)
    flags_apply = ms_any.astype(jnp.int32)

    tables = _hist_tables(flags_hist, src_f, tgt_f, ms4, mr4,
                          chunk=chunk, oh_dtype=oh_dtype)
    pgt = _apply_blend(flags_apply, tables, src_f, ms4, blur,
                       chunk=chunk, oh_dtype=oh_dtype)

    # TODO(synk): `fine_align` (landmark-guided local re-alignment) and the
    # per-region blend_alphas have no provided reference implementation;
    # omitted, so lms_srcs / lms_tars / blend_alphas only keep signature parity.
    del lms_srcs, lms_tars, blend_alphas
    return pgt.reshape(B, C, H, W)


class ComposePGT:
    """JAX/Pallas equivalent of the PyTorch ComposePGT module (no parameters)."""

    def __init__(self, margins, skin_alpha, eye_alpha, lip_alpha):
        self.margins = margins
        self.blend_alphas = {'skin': skin_alpha, 'eye': eye_alpha, 'lip': lip_alpha}

    def __call__(self, sources, targets, mask_srcs, mask_tars, lms_srcs, lms_tars):
        return compose_pgt(sources, targets, mask_srcs, mask_tars,
                           lms_srcs, lms_tars, self.margins, self.blend_alphas)


if __name__ == "__main__":
    key = jax.random.PRNGKey(0)
    B, C, H, W = 2, 3, 16, 16
    k1, k2, k3, k4 = jax.random.split(key, 4)

    sources = jax.random.uniform(k1, (B, C, H, W), jnp.float32, -1.0, 1.0)
    targets = jax.random.uniform(k2, (B, C, H, W), jnp.float32, -1.0, 1.0)

    yy = jnp.arange(H)[:, None]
    xx = jnp.arange(W)[None, :]

    def box(y0, y1, x0, x1):
        return (((yy >= y0) & (yy < y1) & (xx >= x0) & (xx < x1))
                .astype(jnp.float32))

    lip = box(10, 12, 5, 11)
    skin = box(1, 13, 2, 14)
    leye = box(4, 6, 4, 7)
    reye = box(4, 6, 9, 12)
    neck = box(13, 16, 4, 12)
    mask = jnp.stack([lip, skin, leye, reye, neck], axis=0)        # (5, H, W)
    mask_srcs = jnp.stack([mask, jnp.roll(mask, 1, axis=2)], axis=0)
    mask_tars = jnp.stack([jnp.roll(mask, -1, axis=1), mask], axis=0)

    lms_srcs = jax.random.uniform(k3, (B, 68, 2), jnp.float32, 0.0, float(H))
    lms_tars = jax.random.uniform(k4, (B, 68, 2), jnp.float32, 0.0, float(H))

    model = ComposePGT(margins={'eye': 2, 'lip': 4},
                       skin_alpha=0.3, eye_alpha=0.8, lip_alpha=0.1)
    pgt = model(sources, targets, mask_srcs, mask_tars, lms_srcs, lms_tars)
    pgt = jax.block_until_ready(pgt)

    assert pgt.shape == (B, C, H, W), pgt.shape
    assert bool(jnp.all(jnp.isfinite(pgt)))
    print("KERNEL_OK")
</pallas_src>

<mosaic_0001>
module attributes {stable_mosaic.version = 11 : i64} {
  func.func @_mask_prep_kernel(%arg0: i32, %arg1: memref<1x5x16x16xf32, #tpu.memory_space<vmem>>, %arg2: memref<1x5x16x16xf32, #tpu.memory_space<vmem>>, %arg3: memref<1x4x16x16xf32, #tpu.memory_space<vmem>>, %arg4: memref<1x4x16x16xf32, #tpu.memory_space<vmem>>, %arg5: memref<1x1x16x16xf32, #tpu.memory_space<vmem>>) attributes {dimension_semantics = [#tpu.dimension_semantics<parallel>], iteration_bounds = array<i64: 2>, scalar_prefetch = 0 : i64, scratch_operands = 0 : i64, tpu.core_type = #tpu.core_type<tc>, window_params = [{transform_indices = @transform_0, window_bounds = array<i64: 1, 5, 16, 16>}, {transform_indices = @transform_1, window_bounds = array<i64: 1, 5, 16, 16>}, {transform_indices = @transform_2, window_bounds = array<i64: 1, 4, 16, 16>}, {transform_indices = @transform_3, window_bounds = array<i64: 1, 4, 16, 16>}, {transform_indices = @transform_4, window_bounds = array<i64: 1, 1, 16, 16>}]} {
    %0 = tpu.iota {dimensions = array<i32: 0>} : vector<16x16xi32>
    %1 = tpu.iota {dimensions = array<i32: 1>} : vector<16x16xi32>
    %c0 = arith.constant 0 : index
    %c0_0 = arith.constant 0 : index
    %c0_1 = arith.constant 0 : index
    %c0_2 = arith.constant 0 : index
    %2 = vector.load %arg1[%c0, %c0_0, %c0_1, %c0_2] : memref<1x5x16x16xf32, #tpu.memory_space<vmem>>, vector<1x5x16x16xf32>
    %3 = vector.shape_cast %2 : vector<1x5x16x16xf32> to vector<5x16x16xf32>
    %4 = vector.extract_strided_slice %3 {offsets = [2, 0, 0], sizes = [1, 16, 16], strides = [1, 1, 1]} : vector<5x16x16xf32> to vector<1x16x16xf32>
    %5 = vector.shape_cast %4 : vector<1x16x16xf32> to vector<16x16xf32>
    %6 = vector.extract_strided_slice %3 {offsets = [3, 0, 0], sizes = [1, 16, 16], strides = [1, 1, 1]} : vector<5x16x16xf32> to vector<1x16x16xf32>
    %7 = vector.shape_cast %6 : vector<1x16x16xf32> to vector<16x16xf32>
    %8 = arith.addf %5, %7 : vector<16x16xf32>
    %c1_i32 = arith.constant 1 : i32
    %9 = tpu.dynamic_rotate %8 by %c1_i32 dim 0 : vector<16x16xf32>, i32 -> vector<16x16xf32>
    %c1_i32_3 = arith.constant 1 : i32
    %10 = vector.broadcast %c1_i32_3 : i32 to vector<16x16xi32>
    %11 = arith.cmpi sge, %0, %10 : vector<16x16xi32>
    %cst = arith.constant 0.000000e+00 : f32
    %12 = vector.broadcast %cst : f32 to vector<16x16xf32>
    %13 = arith.select %11, %9, %12 : vector<16x16xi1>, vector<16x16xf32>
    %c15_i32 = arith.constant 15 : i32
    %14 = tpu.dynamic_rotate %8 by %c15_i32 dim 0 : vector<16x16xf32>, i32 -> vector<16x16xf32>
    %c15_i32_4 = arith.constant 15 : i32
    %15 = vector.broadcast %c15_i32_4 : i32 to vector<16x16xi32>
    %16 = arith.cmpi slt, %0, %15 : vector<16x16xi32>
    %cst_5 = arith.constant 0.000000e+00 : f32
    %17 = vector.broadcast %cst_5 : f32 to vector<16x16xf32>
    %18 = arith.select %16, %14, %17 : vector<16x16xi1>, vector<16x16xf32>
    %19 = arith.maximumf %13, %18 : vector<16x16xf32>
    %20 = arith.maximumf %8, %19 : vector<16x16xf32>
    %c2_i32 = arith.constant 2 : i32
    %21 = tpu.dynamic_rotate %8 by %c2_i32 dim 0 : vector<16x16xf32>, i32 -> vector<16x16xf32>
    %c2_i32_6 = arith.constant 2 : i32
    %22 = vector.broadcast %c2_i32_6 : i32 to vector<16x16xi32>
    %23 = arith.cmpi sge, %0, %22 : vector<16x16xi32>
    %cst_7 = arith.constant 0.000000e+00 : f32
    %24 = vector.broadcast %cst_7 : f32 to vector<16x16xf32>
    %25 = arith.select %23, %21, %24 : vector<16x16xi1>, vector<16x16xf32>
    %c14_i32 = arith.constant 14 : i32
    %26 = tpu.dynamic_rotate %8 by %c14_i32 dim 0 : vector<16x16xf32>, i32 -> vector<16x16xf32>
    %c14_i32_8 = arith.constant 14 : i32
    %27 = vector.broadcast %c14_i32_8 : i32 to vector<16x16xi32>
    %28 = arith.cmpi slt, %0, %27 : vector<16x16xi32>
    %cst_9 = arith.constant 0.000000e+00 : f32
    %29 = vector.broadcast %cst_9 : f32 to vector<16x16xf32>
    %30 = arith.select %28, %26, %29 : vector<16x16xi1>, vector<16x16xf32>
    %31 = arith.maximumf %25, %30 : vector<16x16xf32>
    %32 = arith.maximumf %20, %31 : vector<16x16xf32>
    %c1_i32_10 = arith.constant 1 : i32
    %33 = tpu.dynamic_rotate %32 by %c1_i32_10 dim 1 : vector<16x16xf32>, i32 -> vector<16x16xf32>
    %c1_i32_11 = arith.constant 1 : i32
    %34 = vector.broadcast %c1_i32_11 : i32 to vector<16x16xi32>
    %35 = arith.cmpi sge, %1, %34 : vector<16x16xi32>
    %cst_12 = arith.constant 0.000000e+00 : f32
    %36 = vector.broadcast %cst_12 : f32 to vector<16x16xf32>
    %37 = arith.select %35, %33, %36 : vector<16x16xi1>, vector<16x16xf32>
    %c15_i32_13 = arith.constant 15 : i32
    %38 = tpu.dynamic_rotate %32 by %c15_i32_13 dim 1 : vector<16x16xf32>, i32 -> vector<16x16xf32>
    %c15_i32_14 = arith.constant 15 : i32
    %39 = vector.broadcast %c15_i32_14 : i32 to vector<16x16xi32>
    %40 = arith.cmpi slt, %1, %39 : vector<16x16xi32>
    %cst_15 = arith.constant 0.000000e+00 : f32
    %41 = vector.broadcast %cst_15 : f32 to vector<16x16xf32>
    %42 = arith.select %40, %38, %41 : vector<16x16xi1>, vector<16x16xf32>
    %43 = arith.maximumf %37, %42 : vector<16x16xf32>
    %44 = arith.maximumf %32, %43 : vector<16x16xf32>
    %c2_i32_16 = arith.constant 2 : i32
    %45 = tpu.dynamic_rotate %32 by %c2_i32_16 dim 1 : vector<16x16xf32>, i32 -> vector<16x16xf32>
    %c2_i32_17 = arith.constant 2 : i32
    %46 = vector.broadcast %c2_i32_17 : i32 to vector<16x16xi32>
    %47 = arith.cmpi sge, %1, %46 : vector<16x16xi32>
    %cst_18 = arith.constant 0.000000e+00 : f32
    %48 = vector.broadcast %cst_18 : f32 to vector<16x16xf32>
    %49 = arith.select %47, %45, %48 : vector<16x16xi1>, vector<16x16xf32>
    %c14_i32_19 = arith.constant 14 : i32
    %50 = tpu.dynamic_rotate %32 by %c14_i32_19 dim 1 : vector<16x16xf32>, i32 -> vector<16x16xf32>
    %c14_i32_20 = arith.constant 14 : i32
    %51 = vector.broadcast %c14_i32_20 : i32 to vector<16x16xi32>
    %52 = arith.cmpi slt, %1, %51 : vector<16x16xi32>
    %cst_21 = arith.constant 0.000000e+00 : f32
    %53 = vector.broadcast %cst_21 : f32 to vector<16x16xf32>
    %54 = arith.select %52, %50, %53 : vector<16x16xi1>, vector<16x16xf32>
    %55 = arith.maximumf %49, %54 : vector<16x16xf32>
    %56 = arith.maximumf %44, %55 : vector<16x16xf32>
    %cst_22 = arith.constant 0.000000e+00 : f32
    %57 = vector.broadcast %cst_22 : f32 to vector<16x16xf32>
    %58 = arith.cmpf ogt, %56, %57 : vector<16x16xf32>
    %59 = arith.extui %58 : vector<16x16xi1> to vector<16x16xi32>
    %60 = arith.sitofp %59 : vector<16x16xi32> to vector<16x16xf32>
    %61 = vector.extract_strided_slice %3 {offsets = [1, 0, 0], sizes = [1, 16, 16], strides = [1, 1, 1]} : vector<5x16x16xf32> to vector<1x16x16xf32>
    %62 = vector.shape_cast %61 : vector<1x16x16xf32> to vector<16x16xf32>
    %63 = arith.mulf %60, %62 : vector<16x16xf32>
    %64 = vector.extract_strided_slice %3 {offsets = [1, 0, 0], sizes = [1, 16, 16], strides = [1, 1, 1]} : vector<5x16x16xf32> to vector<1x16x16xf32>
    %65 = vector.shape_cast %64 : vector<1x16x16xf32> to vector<16x16xf32>
    %c0_23 = arith.constant 0 : index
    %c0_24 = arith.constant 0 : index
    %c0_25 = arith.constant 0 : index
    %c0_26 = arith.constant 0 : index
    %66 = vector.load %arg3[%c0_23, %c0_24, %c0_25, %c0_26] : memref<1x4x16x16xf32, #tpu.memory_space<vmem>>, vector<1x1x16x16xf32>
    %67 = vector.shape_cast %66 : vector<1x1x16x16xf32> to vector<16x16xf32>
    %68 = vector.shape_cast %65 : vector<16x16xf32> to vector<1x1x16x16xf32>
    tpu.vector_store %arg3[%c0_23, %c0_24, %c0_25, %c0_26], %68 {strides = array<i32>} : memref<1x4x16x16xf32, #tpu.memory_space<vmem>>, vector<1x1x16x16xf32>,
    %69 = vector.extract_strided_slice %3 {offsets = [4, 0, 0], sizes = [1, 16, 16], strides = [1, 1, 1]} : vector<5x16x16xf32> to vector<1x16x16xf32>
    %70 = vector.shape_cast %69 : vector<1x16x16xf32> to vector<16x16xf32>
    %c0_27 = arith.constant 0 : index
    %c1 = arith.constant 1 : index
    %c0_28 = arith.constant 0 : index
    %c0_29 = arith.constant 0 : index
    %71 = vector.load %arg3[%c0_27, %c1, %c0_28, %c0_29] : memref<1x4x16x16xf32, #tpu.memory_space<vmem>>, vector<1x1x16x16xf32>
    %72 = vector.shape_cast %71 : vector<1x1x16x16xf32> to vector<16x16xf32>
    %73 = vector.shape_cast %70 : vector<16x16xf32> to vector<1x1x16x16xf32>
    tpu.vector_store %arg3[%c0_27, %c1, %c0_28, %c0_29], %73 {strides = array<i32>} : memref<1x4x16x16xf32, #tpu.memory_space<vmem>>, vector<1x1x16x16xf32>,
    %74 = vector.extract_strided_slice %3 {offsets = [0, 0, 0], sizes = [1, 16, 16], strides = [1, 1, 1]} : vector<5x16x16xf32> to vector<1x16x16xf32>
    %75 = vector.shape_cast %74 : vector<1x16x16xf32> to vector<16x16xf32>
    %c0_30 = arith.constant 0 : index
    %c2 = arith.constant 2 : index
    %c0_31 = arith.constant 0 : index
    %c0_32 = arith.constant 0 : index
    %76 = vector.load %arg3[%c0_30, %c2, %c0_31, %c0_32] : memref<1x4x16x16xf32, #tpu.memory_space<vmem>>, vector<1x1x16x16xf32>
    %77 = vector.shape_cast %76 : vector<1x1x16x16xf32> to vector<16x16xf32>
    %78 = vector.shape_cast %75 : vector<16x16xf32> to vector<1x1x16x16xf32>
    tpu.vector_store %arg3[%c0_30, %c2, %c0_31, %c0_32], %78 {strides = array<i32>} : memref<1x4x16x16xf32, #tpu.memory_space<vmem>>, vector<1x1x16x16xf32>,
    %c0_33 = arith.constant 0 : index
    %c3 = arith.constant 3 : index
    %c0_34 = arith.constant 0 : index
    %c0_35 = arith.constant 0 : index
    %79 = vector.load %arg3[%c0_33, %c3, %c0_34, %c0_35] : memref<1x4x16x16xf32, #tpu.memory_space<vmem>>, vector<1x1x16x16xf32>
    %80 = vector.shape_cast %79 : vector<1x1x16x16xf32> to vector<16x16xf32>
    %81 = vector.shape_cast %63 : vector<16x16xf32> to vector<1x1x16x16xf32>
    tpu.vector_store %arg3[%c0_33, %c3, %c0_34, %c0_35], %81 {strides = array<i32>} : memref<1x4x16x16xf32, #tpu.memory_space<vmem>>, vector<1x1x16x16xf32>,
    %c0_36 = arith.constant 0 : index
    %c0_37 = arith.constant 0 : index
    %c0_38 = arith.constant 0 : index
    %c0_39 = arith.constant 0 : index
    %82 = vector.load %arg2[%c0_36, %c0_37, %c0_38, %c0_39] : memref<1x5x16x16xf32, #tpu.memory_space<vmem>>, vector<1x5x16x16xf32>
    %83 = vector.shape_cast %82 : vector<1x5x16x16xf32> to vector<5x16x16xf32>
    %84 = vector.extract_strided_slice %83 {offsets = [2, 0, 0], sizes = [1, 16, 16], strides = [1, 1, 1]} : vector<5x16x16xf32> to vector<1x16x16xf32>
    %85 = vector.shape_cast %84 : vector<1x16x16xf32> to vector<16x16xf32>
    %86 = vector.extract_strided_slice %83 {offsets = [3, 0, 0], sizes = [1, 16, 16], strides = [1, 1, 1]} : vector<5x16x16xf32> to vector<1x16x16xf32>
    %87 = vector.shape_cast %86 : vector<1x16x16xf32> to vector<16x16xf32>
    %88 = arith.addf %85, %87 : vector<16x16xf32>
    %c1_i32_40 = arith.constant 1 : i32
    %89 = tpu.dynamic_rotate %88 by %c1_i32_40 dim 0 : vector<16x16xf32>, i32 -> vector<16x16xf32>
    %c1_i32_41 = arith.constant 1 : i32
    %90 = vector.broadcast %c1_i32_41 : i32 to vector<16x16xi32>
    %91 = arith.cmpi sge, %0, %90 : vector<16x16xi32>
    %cst_42 = arith.constant 0.000000e+00 : f32
    %92 = vector.broadcast %cst_42 : f32 to vector<16x16xf32>
    %93 = arith.select %91, %89, %92 : vector<16x16xi1>, vector<16x16xf32>
    %c15_i32_43 = arith.constant 15 : i32
    %94 = tpu.dynamic_rotate %88 by %c15_i32_43 dim 0 : vector<16x16xf32>, i32 -> vector<16x16xf32>
    %c15_i32_44 = arith.constant 15 : i32
    %95 = vector.broadcast %c15_i32_44 : i32 to vector<16x16xi32>
    %96 = arith.cmpi slt, %0, %95 : vector<16x16xi32>
    %cst_45 = arith.constant 0.000000e+00 : f32
    %97 = vector.broadcast %cst_45 : f32 to vector<16x16xf32>
    %98 = arith.select %96, %94, %97 : vector<16x16xi1>, vector<16x16xf32>
    %99 = arith.maximumf %93, %98 : vector<16x16xf32>
    %100 = arith.maximumf %88, %99 : vector<16x16xf32>
    %c2_i32_46 = arith.constant 2 : i32
    %101 = tpu.dynamic_rotate %88 by %c2_i32_46 dim 0 : vector<16x16xf32>, i32 -> vector<16x16xf32>
    %c2_i32_47 = arith.constant 2 : i32
    %102 = vector.broadcast %c2_i32_47 : i32 to vector<16x16xi32>
    %103 = arith.cmpi sge, %0, %102 : vector<16x16xi32>
    %cst_48 = arith.constant 0.000000e+00 : f32
    %104 = vector.broadcast %cst_48 : f32 to vector<16x16xf32>
    %105 = arith.select %103, %101, %104 : vector<16x16xi1>, vector<16x16xf32>
    %c14_i32_49 = arith.constant 14 : i32
    %106 = tpu.dynamic_rotate %88 by %c14_i32_49 dim 0 : vector<16x16xf32>, i32 -> vector<16x16xf32>
    %c14_i32_50 = arith.constant 14 : i32
    %107 = vector.broadcast %c14_i32_50 : i32 to vector<16x16xi32>
    %108 = arith.cmpi slt, %0, %107 : vector<16x16xi32>
    %cst_51 = arith.constant 0.000000e+00 : f32
    %109 = vector.broadcast %cst_51 : f32 to vector<16x16xf32>
    %110 = arith.select %108, %106, %109 : vector<16x16xi1>, vector<16x16xf32>
    %111 = arith.maximumf %105, %110 : vector<16x16xf32>
    %112 = arith.maximumf %100, %111 : vector<16x16xf32>
    %c1_i32_52 = arith.constant 1 : i32
    %113 = tpu.dynamic_rotate %112 by %c1_i32_52 dim 1 : vector<16x16xf32>, i32 -> vector<16x16xf32>
    %c1_i32_53 = arith.constant 1 : i32
    %114 = vector.broadcast %c1_i32_53 : i32 to vector<16x16xi32>
    %115 = arith.cmpi sge, %1, %114 : vector<16x16xi32>
    %cst_54 = arith.constant 0.000000e+00 : f32
    %116 = vector.broadcast %cst_54 : f32 to vector<16x16xf32>
    %117 = arith.select %115, %113, %116 : vector<16x16xi1>, vector<16x16xf32>
    %c15_i32_55 = arith.constant 15 : i32
    %118 = tpu.dynamic_rotate %112 by %c15_i32_55 dim 1 : vector<16x16xf32>, i32 -> vector<16x16xf32>
    %c15_i32_56 = arith.constant 15 : i32
    %119 = vector.broadcast %c15_i32_56 : i32 to vector<16x16xi32>
    %120 = arith.cmpi slt, %1, %119 : vector<16x16xi32>
    %cst_57 = arith.constant 0.000000e+00 : f32
    %121 = vector.broadcast %cst_57 : f32 to vector<16x16xf32>
    %122 = arith.select %120, %118, %121 : vector<16x16xi1>, vector<16x16xf32>
    %123 = arith.maximumf %117, %122 : vector<16x16xf32>
    %124 = arith.maximumf %112, %123 : vector<16x16xf32>
    %c2_i32_58 = arith.constant 2 : i32
    %125 = tpu.dynamic_rotate %112 by %c2_i32_58 dim 1 : vector<16x16xf32>, i32 -> vector<16x16xf32>
    %c2_i32_59 = arith.constant 2 : i32
    %126 = vector.broadcast %c2_i32_59 : i32 to vector<16x16xi32>
    %127 = arith.cmpi sge, %1, %126 : vector<16x16xi32>
    %cst_60 = arith.constant 0.000000e+00 : f32
    %128 = vector.broadcast %cst_60 : f32 to vector<16x16xf32>
    %129 = arith.select %127, %125, %128 : vector<16x16xi1>, vector<16x16xf32>
    %c14_i32_61 = arith.constant 14 : i32
    %130 = tpu.dynamic_rotate %112 by %c14_i32_61 dim 1 : vector<16x16xf32>, i32 -> vector<16x16xf32>
    %c14_i32_62 = arith.constant 14 : i32
    %131 = vector.broadcast %c14_i32_62 : i32 to vector<16x16xi32>
    %132 = arith.cmpi slt, %1, %131 : vector<16x16xi32>
    %cst_63 = arith.constant 0.000000e+00 : f32
    %133 = vector.broadcast %cst_63 : f32 to vector<16x16xf32>
    %134 = arith.select %132, %130, %133 : vector<16x16xi1>, vector<16x16xf32>
    %135 = arith.maximumf %129, %134 : vector<16x16xf32>
    %136 = arith.maximumf %124, %135 : vector<16x16xf32>
    %cst_64 = arith.constant 0.000000e+00 : f32
    %137 = vector.broadcast %cst_64 : f32 to vector<16x16xf32>
    %138 = arith.cmpf ogt, %136, %137 : vector<16x16xf32>
    %139 = arith.extui %138 : vector<16x16xi1> to vector<16x16xi32>
    %140 = arith.sitofp %139 : vector<16x16xi32> to vector<16x16xf32>
    %141 = vector.extract_strided_slice %83 {offsets = [1, 0, 0], sizes = [1, 16, 16], strides = [1, 1, 1]} : vector<5x16x16xf32> to vector<1x16x16xf32>
    %142 = vector.shape_cast %141 : vector<1x16x16xf32> to vector<16x16xf32>
    %143 = arith.mulf %140, %142 : vector<16x16xf32>
    %144 = vector.extract_strided_slice %83 {offsets = [1, 0, 0], sizes = [1, 16, 16], strides = [1, 1, 1]} : vector<5x16x16xf32> to vector<1x16x16xf32>
    %145 = vector.shape_cast %144 : vector<1x16x16xf32> to vector<16x16xf32>
    %c0_65 = arith.constant 0 : index
    %c0_66 = arith.constant 0 : index
    %c0_67 = arith.constant 0 : index
    %c0_68 = arith.constant 0 : index
    %146 = vector.load %arg4[%c0_65, %c0_66, %c0_67, %c0_68] : memref<1x4x16x16xf32, #tpu.memory_space<vmem>>, vector<1x1x16x16xf32>
    %147 = vector.shape_cast %146 : vector<1x1x16x16xf32> to vector<16x16xf32>
    %148 = vector.shape_cast %145 : vector<16x16xf32> to vector<1x1x16x16xf32>
    tpu.vector_store %arg4[%c0_65, %c0_66, %c0_67, %c0_68], %148 {strides = array<i32>} : memref<1x4x16x16xf32, #tpu.memory_space<vmem>>, vector<1x1x16x16xf32>,
    %149 = vector.extract_strided_slice %83 {offsets = [4, 0, 0], sizes = [1, 16, 16], strides = [1, 1, 1]} : vector<5x16x16xf32> to vector<1x16x16xf32>
    %150 = vector.shape_cast %149 : vector<1x16x16xf32> to vector<16x16xf32>
    %c0_69 = arith.constant 0 : index
    %c1_70 = arith.constant 1 : index
    %c0_71 = arith.constant 0 : index
    %c0_72 = arith.constant 0 : index
    %151 = vector.load %arg4[%c0_69, %c1_70, %c0_71, %c0_72] : memref<1x4x16x16xf32, #tpu.memory_space<vmem>>, vector<1x1x16x16xf32>
    %152 = vector.shape_cast %151 : vector<1x1x16x16xf32> to vector<16x16xf32>
    %153 = vector.shape_cast %150 : vector<16x16xf32> to vector<1x1x16x16xf32>
    tpu.vector_store %arg4[%c0_69, %c1_70, %c0_71, %c0_72], %153 {strides = array<i32>} : memref<1x4x16x16xf32, #tpu.memory_space<vmem>>, vector<1x1x16x16xf32>,
    %154 = vector.extract_strided_slice %83 {offsets = [0, 0, 0], sizes = [1, 16, 16], strides = [1, 1, 1]} : vector<5x16x16xf32> to vector<1x16x16xf32>
    %155 = vector.shape_cast %154 : vector<1x16x16xf32> to vector<16x16xf32>
    %c0_73 = arith.constant 0 : index
    %c2_74 = arith.constant 2 : index
    %c0_75 = arith.constant 0 : index
    %c0_76 = arith.constant 0 : index
    %156 = vector.load %arg4[%c0_73, %c2_74, %c0_75, %c0_76] : memref<1x4x16x16xf32, #tpu.memory_space<vmem>>, vector<1x1x16x16xf32>
    %157 = vector.shape_cast %156 : vector<1x1x16x16xf32> to vector<16x16xf32>
    %158 = vector.shape_cast %155 : vector<16x16xf32> to vector<1x1x16x16xf32>
    tpu.vector_store %arg4[%c0_73, %c2_74, %c0_75, %c0_76], %158 {strides = array<i32>} : memref<1x4x16x16xf32, #tpu.memory_space<vmem>>, vector<1x1x16x16xf32>,
    %c0_77 = arith.constant 0 : index
    %c3_78 = arith.constant 3 : index
    %c0_79 = arith.constant 0 : index
    %c0_80 = arith.constant 0 : index
    %159 = vector.load %arg4[%c0_77, %c3_78, %c0_79, %c0_80] : memref<1x4x16x16xf32, #tpu.memory_space<vmem>>, vector<1x1x16x16xf32>
    %160 = vector.shape_cast %159 : vector<1x1x16x16xf32> to vector<16x16xf32>
    %161 = vector.shape_cast %143 : vector<16x16xf32> to vector<1x1x16x16xf32>
    tpu.vector_store %arg4[%c0_77, %c3_78, %c0_79, %c0_80], %161 {strides = array<i32>} : memref<1x4x16x16xf32, #tpu.memory_space<vmem>>, vector<1x1x16x16xf32>,
    %c1_i32_81 = arith.constant 1 : i32
    %162 = tpu.dynamic_rotate %63 by %c1_i32_81 dim 0 : vector<16x16xf32>, i32 -> vector<16x16xf32>
    %c1_i32_82 = arith.constant 1 : i32
    %163 = vector.broadcast %c1_i32_82 : i32 to vector<16x16xi32>
    %164 = arith.cmpi sge, %0, %163 : vector<16x16xi32>
    %cst_83 = arith.constant 0.000000e+00 : f32
    %165 = vector.broadcast %cst_83 : f32 to vector<16x16xf32>
    %166 = arith.select %164, %162, %165 : vector<16x16xi1>, vector<16x16xf32>
    %167 = arith.addf %63, %166 : vector<16x16xf32>
    %c15_i32_84 = arith.constant 15 : i32
    %168 = tpu.dynamic_rotate %63 by %c15_i32_84 dim 0 : vector<16x16xf32>, i32 -> vector<16x16xf32>
    %c15_i32_85 = arith.constant 15 : i32
    %169 = vector.broadcast %c15_i32_85 : i32 to vector<16x16xi32>
    %170 = arith.cmpi slt, %0, %169 : vector<16x16xi32>
    %cst_86 = arith.constant 0.000000e+00 : f32
    %171 = vector.broadcast %cst_86 : f32 to vector<16x16xf32>
    %172 = arith.select %170, %168, %171 : vector<16x16xi1>, vector<16x16xf32>
    %173 = arith.addf %167, %172 : vector<16x16xf32>
    %c2_i32_87 = arith.constant 2 : i32
    %174 = tpu.dynamic_rotate %63 by %c2_i32_87 dim 0 : vector<16x16xf32>, i32 -> vector<16x16xf32>
    %c2_i32_88 = arith.constant 2 : i32
    %175 = vector.broadcast %c2_i32_88 : i32 to vector<16x16xi32>
    %176 = arith.cmpi sge, %0, %175 : vector<16x16xi32>
    %cst_89 = arith.constant 0.000000e+00 : f32
    %177 = vector.broadcast %cst_89 : f32 to vector<16x16xf32>
    %178 = arith.select %176, %174, %177 : vector<16x16xi1>, vector<16x16xf32>
    %179 = arith.addf %173, %178 : vector<16x16xf32>
    %c14_i32_90 = arith.constant 14 : i32
    %180 = tpu.dynamic_rotate %63 by %c14_i32_90 dim 0 : vector<16x16xf32>, i32 -> vector<16x16xf32>
    %c14_i32_91 = arith.constant 14 : i32
    %181 = vector.broadcast %c14_i32_91 : i32 to vector<16x16xi32>
    %182 = arith.cmpi slt, %0, %181 : vector<16x16xi32>
    %cst_92 = arith.constant 0.000000e+00 : f32
    %183 = vector.broadcast %cst_92 : f32 to vector<16x16xf32>
    %184 = arith.select %182, %180, %183 : vector<16x16xi1>, vector<16x16xf32>
    %185 = arith.addf %179, %184 : vector<16x16xf32>
    %c1_i32_93 = arith.constant 1 : i32
    %186 = tpu.dynamic_rotate %185 by %c1_i32_93 dim 1 : vector<16x16xf32>, i32 -> vector<16x16xf32>
    %c1_i32_94 = arith.constant 1 : i32
    %187 = vector.broadcast %c1_i32_94 : i32 to vector<16x16xi32>
    %188 = arith.cmpi sge, %1, %187 : vector<16x16xi32>
    %cst_95 = arith.constant 0.000000e+00 : f32
    %189 = vector.broadcast %cst_95 : f32 to vector<16x16xf32>
    %190 = arith.select %188, %186, %189 : vector<16x16xi1>, vector<16x16xf32>
    %191 = arith.addf %185, %190 : vector<16x16xf32>
    %c15_i32_96 = arith.constant 15 : i32
    %192 = tpu.dynamic_rotate %185 by %c15_i32_96 dim 1 : vector<16x16xf32>, i32 -> vector<16x16xf32>
    %c15_i32_97 = arith.constant 15 : i32
    %193 = vector.broadcast %c15_i32_97 : i32 to vector<16x16xi32>
    %194 = arith.cmpi slt, %1, %193 : vector<16x16xi32>
    %cst_98 = arith.constant 0.000000e+00 : f32
    %195 = vector.broadcast %cst_98 : f32 to vector<16x16xf32>
    %196 = arith.select %194, %192, %195 : vector<16x16xi1>, vector<16x16xf32>
    %197 = arith.addf %191, %196 : vector<16x16xf32>
    %c2_i32_99 = arith.constant 2 : i32
    %198 = tpu.dynamic_rotate %185 by %c2_i32_99 dim 1 : vector<16x16xf32>, i32 -> vector<16x16xf32>
    %c2_i32_100 = arith.constant 2 : i32
    %199 = vector.broadcast %c2_i32_100 : i32 to vector<16x16xi32>
    %200 = arith.cmpi sge, %1, %199 : vector<16x16xi32>
    %cst_101 = arith.constant 0.000000e+00 : f32
    %201 = vector.broadcast %cst_101 : f32 to vector<16x16xf32>
    %202 = arith.select %200, %198, %201 : vector<16x16xi1>, vector<16x16xf32>
    %203 = arith.addf %197, %202 : vector<16x16xf32>
    %c14_i32_102 = arith.constant 14 : i32
    %204 = tpu.dynamic_rotate %185 by %c14_i32_102 dim 1 : vector<16x16xf32>, i32 -> vector<16x16xf32>
    %c14_i32_103 = arith.constant 14 : i32
    %205 = vector.broadcast %c14_i32_103 : i32 to vector<16x16xi32>
    %206 = arith.cmpi slt, %1, %205 : vector<16x16xi32>
    %cst_104 = arith.constant 0.000000e+00 : f32
    %207 = vector.broadcast %cst_104 : f32 to vector<16x16xf32>
    %208 = arith.select %206, %204, %207 : vector<16x16xi1>, vector<16x16xf32>
    %209 = arith.addf %203, %208 : vector<16x16xf32>
    %cst_105 = arith.constant 4.000000e-02 : f32
    %210 = vector.broadcast %cst_105 : f32 to vector<16x16xf32>
    %211 = arith.mulf %209, %210 : vector<16x16xf32>
    %212 = arith.mulf %211, %63 : vector<16x16xf32>
    %c0_106 = arith.constant 0 : index
    %c0_107 = arith.constant 0 : index
    %c0_108 = arith.constant 0 : index
    %c0_109 = arith.constant 0 : index
    %213 = vector.load %arg5[%c0_106, %c0_107, %c0_108, %c0_109] : memref<1x1x16x16xf32, #tpu.memory_space<vmem>>, vector<1x1x16x16xf32>
    %214 = vector.shape_cast %213 : vector<1x1x16x16xf32> to vector<16x16xf32>
    %215 = vector.shape_cast %212 : vector<16x16xf32> to vector<1x1x16x16xf32>
    tpu.vector_store %arg5[%c0_106, %c0_107, %c0_108, %c0_109], %215 {strides = array<i32>} : memref<1x1x16x16xf32, #tpu.memory_space<vmem>>, vector<1x1x16x16xf32>,
    return
  }
  func.func @transform_0(%arg0: i32) -> (i32, i32, i32, i32) {
    %c0_i32 = arith.constant 0 : i32
    %c0_i32_0 = arith.constant 0 : i32
    %c0_i32_1 = arith.constant 0 : i32
    %c0_i32_2 = arith.constant 0 : i32
    return %arg0, %c0_i32, %c0_i32_0, %c0_i32_1 : i32, i32, i32, i32
  }
  func.func @transform_1(%arg0: i32) -> (i32, i32, i32, i32) {
    %c0_i32 = arith.constant 0 : i32
    %c0_i32_0 = arith.constant 0 : i32
    %c0_i32_1 = arith.constant 0 : i32
    %c0_i32_2 = arith.constant 0 : i32
    return %arg0, %c0_i32, %c0_i32_0, %c0_i32_1 : i32, i32, i32, i32
  }
  func.func @transform_2(%arg0: i32) -> (i32, i32, i32, i32) {
    %c0_i32 = arith.constant 0 : i32
    %c0_i32_0 = arith.constant 0 : i32
    %c0_i32_1 = arith.constant 0 : i32
    %c0_i32_2 = arith.constant 0 : i32
    return %arg0, %c0_i32, %c0_i32_0, %c0_i32_1 : i32, i32, i32, i32
  }
  func.func @transform_3(%arg0: i32) -> (i32, i32, i32, i32) {
    %c0_i32 = arith.constant 0 : i32
    %c0_i32_0 = arith.constant 0 : i32
    %c0_i32_1 = arith.constant 0 : i32
    %c0_i32_2 = arith.constant 0 : i32
    return %arg0, %c0_i32, %c0_i32_0, %c0_i32_1 : i32, i32, i32, i32
  }
  func.func @transform_4(%arg0: i32) -> (i32, i32, i32, i32) {
    %c0_i32 = arith.constant 0 : i32
    %c0_i32_0 = arith.constant 0 : i32
    %c0_i32_1 = arith.constant 0 : i32
    %c0_i32_2 = arith.constant 0 : i32
    return %arg0, %c0_i32, %c0_i32_0, %c0_i32_1 : i32, i32, i32, i32
  }
}

</mosaic_0001>

<bundles_post_ra>
// kernel: tpu_custom_call.1
= control target key start
LH: loop header
LB: loop body
LE: loop exit
PB: predicated region body
PF: predicated region fallthrough
CT: control target
= control target key end

     0   :  { %10 = vsyncpa [#allocation3], 0  ;;  %s1812_s0 = inlined_call_operand.hbm [shape: f32[2,5,16,16], index: 0, kind: input, shape index: {}]   ;;  %s1813_s1 = inlined_call_operand.hbm [shape: f32[2,5,16,16], index: 1, kind: input, shape index: {}]   ;;  %s1814_s2 = inlined_call_operand.hbm [shape: f32[2,4,16,16], index: 2, kind: output, shape index: {0}]   ;;  %s1815_s3 = inlined_call_operand.hbm [shape: f32[2,4,16,16], index: 3, kind: output, shape index: {1}]   ;;  %s1816_s4 = inlined_call_operand.hbm [shape: f32[2,1,16,16], index: 4, kind: output, shape index: {2}]  }
   0x1   :  { %12 = vsyncpa [#allocation3 + $0x1], 0 }
   0x2   :  { %13 = vsyncpa [#allocation6], 0 }
   0x3   :  { %15 = vsyncpa [#allocation6 + $0x1], 0 }
   0x4   :  { %16 = vsyncpa [#allocation4], 0 }
   0x5   :  { %18 = vsyncpa [#allocation4 + $0x1], 0 }
   0x6   :  { %19 = vsyncpa [#allocation9], 0 }
   0x7   :  { %21 = vsyncpa [#allocation9 + $0x1], 0  ;;  %s1183_s15 = smov 0   ;;  %s1185_s16 = smov 0  }
   0x8   :  { %s1187_s17 = smov 0   ;;  %s1189_s18 = smov 0  }
   0x9 LB: > { %s1204_s19 = sadd.s32 4294967295, %s1141_s18   ;;  %s1818_s20 = sadd.s32 4294967294, %s1141_s18   ;;  %s1141_s18 = sphi %s1189_s18, %s1833_s18   ;;  %s1137_s17 = sphi %s1187_s17, %s1832_s17   ;;  %s1133_s16 = sphi %s1185_s16, %s1831_s16   ;;  %s1129_s15 = sphi %s1183_s15, %s1830_s15  }
   0xa   : > { %s1208_s21 = sadd.s32 1, %s1141_s18   ;;  %s34_s22 = sadd.s32 1, %s1137_s17 }
   0xb   : > { %s31_s23 = ssub.s32 %s1141_s18, %s1208_s21  ;;  %p41_p0 = scmp.ne.s32.totalorder %s1137_s17, %s1133_s16 }
   0xc   : > { %p32_p1 = scmp.eq.s32.totalorder %s31_s23, 0  ;;  %p42_p2 = scmp.eq.s32.totalorder %s1141_s18, 0 }
   0xd   : > { %p47_p3 = scmp.ne.s32.totalorder %s1133_s16, %s1129_s15  ;;  %p48_p4 = scmp.eq.s32.totalorder %s1204_s19, 0 }
   0xe   : > { %s1220_s24 = scalar_select %p32_p1, %s1137_s17, %s34_s22  }
   0xf   : > { %p43_p5 = por %p42_p2, %p41_p0  ;;  %p1222_p6 = por %p48_p4, %p47_p3 }
  0x10   : > { %p97_p7 = scmp.eq.s32.totalorder %s1204_s19, 1  ;;  %p103_p8 = scmp.eq.s32.totalorder %s1818_s20, 1 }
  0x11   : > { %s1820_s25 = scalar_select %p1222_p6, 1, 0 }
  0x12   : > { %p907_p10 = scmp.lt.s32.totalorder %s1141_s18, 2  ;;  %p1231_p11 = por %p97_p7, %p41_p0 }
  0x13   : > { %p1235_p12 = por %p103_p8, %p47_p3  ;;  %s1240_s28 = sand.u32 1, %s1137_s17  }
  0x14   : > { %s1821_s26 = scalar_select %p1231_p11, 1, 0 }
  0x15   : > { %s1822_s27 = scalar_select %p1235_p12, 1, 0 }
  0x16   : > { %s876_s29 = smul.u32 1280, %s1141_s18  ;;  %p1251_p13 = pnand %p907_p10, %p43_p5 }
  0x17   : > { %s875_s30 = smul.u32 80, %s1240_s28  ;;  %s176_s11 = scalar_lea.sflag [#allocation3], %s1240_s28 }
  0x18   : > { %s1249_s7 = scalar_lea.hbm %s1812_s0, %s876_s29  ;;  %p953_p1 = pneg %p1251_p13 }
  0x19   : > { %s179_s9 = scalar_lea.vmem [#allocation2], %s875_s30  ;;  %s951_s12 = scalar_lea.hbm %s1249_s7, 1280 }
  0x1a   : > { %s186_s10 = sshll.u32 %s179_s9, 4  ;;  %p952_p0 = scmp.ne.s32.totalorder %s1249_s7, %s951_s12  ;;  %s1257_s10 = int_to_ptr.vmem [resolvable:$true] %s186_s10 }
  0x1b   : > { %s956_s22 = scalar_lea.hbm %s1812_s0, 2560  ;;  %p957_p4 = scmp.lt.u32.totalorder %s1249_s7, %s1812_s0 }
  0x1c   : > { %p954_p2 = pnand %p953_p1, %p952_p0  ;;  %p958_p5 = scmp.lt.u32.totalorder %s956_s22, %s951_s12 }
  0x1d   : > { %p960_p8 = scmp.lt.u32.totalorder %s951_s12, %s1249_s7 }
  0x1e   : > { %p955_p3 = pneg %p954_p2  ;;  %p959_p7 = por %p958_p5, %p957_p4 }
  0x20   : > { %p961_p10 = por %p960_p8, %p959_p7 }
  0x22   : > { %p962_p9 = pnand %p961_p10, %p955_p3 }
  0x24   : > { %965 = shalt.err (!%p962_p9)
}
  0x25   : > { %s966_s6 = scalar_lea.vmem %s1257_s10, 1280  ;;  %s1143_s9 = smov [#allocation2]  }
  0x26   : > { %p967_p0 = scmp.ne.s32.totalorder %s1257_s10, %s966_s6  ;;  %s971_s13 = sshll.u32 %s1143_s9, 4  ;;  %s972_s13 = int_to_ptr.vmem [resolvable:$false] %s971_s13 }
  0x27   : > { %s973_s14 = scalar_lea.vmem %s972_s13, 2560  ;;  %p974_p11 = scmp.lt.s32.totalorder %s1257_s10, %s972_s13 }
  0x28   : > { %p969_p2 = pnand %p967_p0, %p953_p1  ;;  %p975_p4 = scmp.lt.s32.totalorder %s973_s14, %s966_s6 }
  0x2a   : > { %p970_p12 = pneg %p969_p2  ;;  %p976_p5 = por %p975_p4, %p974_p11 }
  0x2c   : > { %p977_p7 = pnand %p976_p5, %p970_p12 }
  0x2e   : > { %980 = shalt.err (!%p977_p7)
}
  0x2f   : > { %s1144_s12 = smov 128   ;;  %s1145_s22 = smov 8  }
  0x30   : > { %893 = dma.hbm_to_vmem [thread:$0]  (!%p1251_p13), %s1249_s7, 1280, %s1257_s10, %s176_s11, %s1144_s12, %s1144_s12, %s1145_s22  }
  0x31   : > { %p841_p9 = scmp.ge.s32.totalorder %s1141_s18, 1  ;;  %p215_p11 = scmp.lt.s32.totalorder %s1141_s18, 3 }
  0x32   : > { %s1301_s9 = scalar_lea.hbm %s1813_s1, %s876_s29  ;;  %s200_s13 = scalar_lea.vmem [#allocation5], %s875_s30 }
  0x33   : > { %p1292_p12 = pnand %p841_p9, %p215_p11  ;;  %s207_s14 = sshll.u32 %s200_s13, 4  ;;  %s1305_s14 = int_to_ptr.vmem [resolvable:$true] %s207_s14 }
  0x34   : > { %s197_s7 = scalar_lea.sflag [#allocation6], %s1240_s28  ;;  %s981_s10 = scalar_lea.hbm %s1301_s9, 1280 }
  0x35   : > { %p982_p3 = scmp.ne.s32.totalorder %s1301_s9, %s981_s10  ;;  %s986_s29 = scalar_lea.hbm %s1813_s1, 2560 }
  0x36   : > { %p987_p0 = scmp.lt.u32.totalorder %s1301_s9, %s1813_s1  ;;  %p988_p2 = scmp.lt.u32.totalorder %s986_s29, %s981_s10 }
  0x37   : > { %p984_p8 = pnand %p982_p3, %p953_p1  ;;  %p990_p5 = scmp.lt.u32.totalorder %s981_s10, %s1301_s9 }
  0x38   : > { %p989_p4 = por %p988_p2, %p987_p0 }
  0x39   : > { %p985_p10 = pneg %p984_p8 }
  0x3a   : > { %p991_p7 = por %p990_p5, %p989_p4 }
  0x3c   : > { %p992_p9 = pnand %p991_p7, %p985_p10 }
  0x3e   : > { %995 = shalt.err (!%p992_p9)
}
  0x3f   : > { %s996_s30 = scalar_lea.vmem %s1305_s14, 1280  ;;  %s1146_s13 = smov [#allocation5]  }
  0x40   : > { %p997_p11 = scmp.ne.s32.totalorder %s1305_s14, %s996_s30  ;;  %s1001_s11 = sshll.u32 %s1146_s13, 4  ;;  %s1002_s11 = int_to_ptr.vmem [resolvable:$false] %s1001_s11 }
  0x41   : > { %s1003_s20 = scalar_lea.vmem %s1002_s11, 2560  ;;  %p1004_p6 = scmp.lt.s32.totalorder %s1305_s14, %s1002_s11 }
  0x42   : > { %p999_p3 = pnand %p997_p11, %p953_p1  ;;  %p1005_p0 = scmp.lt.s32.totalorder %s1003_s20, %s996_s30 }
  0x44   : > { %p1000_p8 = pneg %p999_p3  ;;  %p1006_p2 = por %p1005_p0, %p1004_p6 }
  0x46   : > { %p1007_p4 = pnand %p1006_p2, %p1000_p8 }
  0x48   : > { %1010 = shalt.err (!%p1007_p4)
}
  0x49   : > { %896 = dma.hbm_to_vmem [thread:$0]  (!%p1251_p13), %s1301_s9, 1280, %s1305_s14, %s197_s7, %s1144_s12, %s1144_s12, %s1145_s22  }
  0x4a   : > { %219 = sbr.rel (%p1292_p12) target bundleno = 901 (0x385), region = 28  ;;  %s1339_s10 = sand.u32 (!%p1292_p12), 1, %s1133_s16  }
  0x4b   : > { %s879_s5 = smul.u32 (!%p1292_p12), 80, %s1339_s10  ;;  %s222_s29 = scalar_lea.sflag (!%p1292_p12), [#allocation3], %s1339_s10 }
  0x4c   : > { %p1825_p6 = scmp.ne.s32.totalorder (!%p1292_p12), %s1820_s25, 0 }
  0x4d   : > { %s1343_s8 = scalar_lea.vmem (!%p1292_p12), [#allocation2], %s879_s5 }
  0x51   : > { %1112 = dma.done.wait (%p1825_p6), %s222_s29, 1280  }
  0x52   : > { %1114 = vsyncadd (%p1825_p6), %s222_s29, 4294966016  ;;  %s231_s28 = scalar_lea.sflag [#allocation6], %s1339_s10  ;;  %s1350_s12 = scalar_lea.vmem [#allocation5], %s879_s5 }
  0x53   : > { %1116 = dma.done.wait (%p1825_p6), %s231_s28, 1280  }
  0x54   : > { %1118 = vsyncadd (%p1825_p6), %s231_s28, 4294966016  ;;  %v274_v0 = vlaneseq  ;;  %v283_v2 = vld [vmem:[%s1343_s8 + $0x20] sm:$0xff]  ;;  %v284_v3 = vld [vmem:[%s1343_s8 + $0x28] sm:$0xff]  ;;  %s1147_s25 = smov 16   ;;  %vm335_vm8 = vcmask 1047680   ;;  %s842_s22 = sshll.u32 %s1339_s10, 6 }
  0x55   : > { %v285_v4 = vld [vmem:[%s1343_s8 + $0x30] sm:$0xff]  ;;  %v286_v5 = vld [vmem:[%s1343_s8 + $0x38] sm:$0xff]  ;;  %s1148_s23 = smov 113   ;;  %vm402_vm9 = vcmask 130048   ;;  %s1414_s9 = scalar_lea.vmem [#allocation7], %s842_s22  ;;  %v418_v55 = vld [vmem:[%s1350_s12 + $0x20] sm:$0xff] }
  0x56   : > { %v1357_v1 = vshrl.u32 %v274_v0, 7  ;;  %v289_v6 = vadd.f32 %v285_v4, %v283_v2  ;;  %v290_v8 = vadd.f32 %v286_v5, %v284_v3  ;;  %v281_v43 = vld [vmem:[%s1343_s8 + $0x10] sm:$0xff]  ;;  %s1149_s14 = smov 127   ;;  %s1150_s7 = smov 114   ;;  %v282_v46 = vld [vmem:[%s1343_s8 + $0x18] sm:$0xff]  ;;  %v1431_v48 = vand.u32 127, %v274_v0 }
  0x57   : > { %403 = vst.msk [vmem:[%s1414_s9] sm:$0xff] %vm402_vm9, %v281_v43  ;;  %404 = vst.msk [vmem:[%s1414_s9 + $0x8] sm:$0xff] %vm402_vm9, %v282_v46  ;;  %s1151_s6 = smov 126   ;;  %v420_v56 = vld [vmem:[%s1350_s12 + $0x30] sm:$0xff]  ;;  %v419_v58 = vld [vmem:[%s1350_s12 + $0x28] sm:$0xff]  ;;  %s1575_s30 = scalar_lea.vmem [#allocation8], %s842_s22 }
  0x58   : > { %vm293_vm0 = vcmp.lt.s32.totalorder %v1357_v1, 1  ;;  %vm296_vm1 = vcmp.ge.s32.totalorder %v1357_v1, 1  ;;  %vm302_vm2 = vcmp.lt.s32.totalorder %v1357_v1, 7  ;;  %v1367_v7 = vadd.s32 8, %v1357_v1  ;;  %v421_v59 = vld [vmem:[%s1350_s12 + $0x38] sm:$0xff]  ;;  %s872_s13 = sshll.u32 %s1204_s19, 10 }
  0x59   : > { %vm315_vm3 = vcmp.lt.s32.totalorder %v1357_v1, 2  ;;  %vm318_vm4 = vcmp.ge.s32.totalorder %v1357_v1, 2  ;;  %vm324_vm5 = vcmp.lt.s32.totalorder %v1357_v1, 6  ;;  %v291_v9 = vrot.slane %v289_v6, 7  ;;  %s1639_s5 = scalar_lea.hbm %s1814_s2, %s872_s13  ;;  %s647_s29 = sshll.u32 %s1414_s9, 4  ;;  %s1642_s29 = int_to_ptr.vmem [resolvable:$true] %s647_s29 }
  0x5a   : > { %v300_v10 = vrot.slane %v289_v6, 1  ;;  %v313_v11 = vrot.slane %v289_v6, 6  ;;  %v322_v12 = vrot.slane %v289_v6, 2  ;;  %v292_v13 = vrot.slane %v290_v8, 7  ;;  %s1011_s28 = scalar_lea.vmem %s1642_s29, 1024  ;;  %p1826_p1 = scmp.ne.s32.totalorder %s1821_s26, 0 }
  0x5b   : > { %v301_v14 = vrot.slane %v290_v8, 1  ;;  %v314_v15 = vrot.slane %v290_v8, 6  ;;  %v323_v16 = vrot.slane %v290_v8, 2  ;;  %vm306_vm6 = vcmp.lt.s32.totalorder %v1367_v7, 15  ;;  %p1012_p13 = scmp.ne.s32.totalorder %s1642_s29, %s1011_s28 }
  0x5c   : > { %vm328_vm7 = vcmp.lt.s32.totalorder %v1367_v7, 14  ;;  %v295_v17 = vsel %vm293_vm0, %v292_v13, %v291_v9  ;;  %v294_v23 = vsel %vm293_vm0, %v291_v9, %v292_v13  ;;  %vm359_vm10 = vcmp.lt.s32.totalorder %v1431_v48, 15 }
  0x5d   : > { %v303_v18 = vsel %vm302_vm2, %v300_v10, %v301_v14  ;;  %v317_v19 = vsel %vm315_vm3, %v314_v15, %v313_v11  ;;  %v325_v20 = vsel %vm324_vm5, %v322_v12, %v323_v16  ;;  %v298_v21 = vsel %vm296_vm1, %v295_v17, 0.0  ;;  %p1013_p12 = pnand %p1012_p13, %p1826_p1 }
  0x5e   : > { %v320_v22 = vsel %vm318_vm4, %v317_v19, 0.0  ;;  %v304_v24 = vsel %vm302_vm2, %v301_v14, %v300_v10  ;;  %v309_v25 = vmax.f32 %v298_v21, %v303_v18  ;;  %v316_v28 = vsel %vm315_vm3, %v313_v11, %v314_v15 }
  0x5f   : > { %v331_v26 = vmax.f32 %v320_v22, %v325_v20  ;;  %v308_v27 = vsel %vm306_vm6, %v304_v24, 0.0  ;;  %v326_v30 = vsel %vm324_vm5, %v323_v16, %v322_v12  ;;  %vm348_vm11 = vcmp.ge.s32.totalorder %v1431_v48, 1  ;;  %p1014_p10 = pneg %p1013_p12 }
  0x60   : > { %v310_v29 = vmax.f32 %v294_v23, %v308_v27  ;;  %v311_v31 = vmax.f32 %v289_v6, %v309_v25  ;;  %v330_v32 = vsel %vm328_vm7, %v326_v30, 0.0  ;;  %vm372_vm12 = vcmp.ge.s32.totalorder %v1431_v48, 2 }
  0x61   : > { %v332_v34 = vmax.f32 %v316_v28, %v330_v32  ;;  %vm381_vm13 = vcmp.lt.s32.totalorder %v1431_v48, 14  ;;  %v1447_v63 = vadd.f32 %v420_v56, %v418_v55  ;;  %v1455_v4 = vadd.f32 %v421_v59, %v419_v58 }
  0x62   : > { %v312_v33 = vmax.f32 %v290_v8, %v310_v29  ;;  %v333_v35 = vmax.f32 %v311_v31, %v331_v26  ;;  %v1152_v17 = vmov 0.0  }
  0x63   : > { %v432_v13 = vrot.slane %v1447_v63, 1  ;;  %v433_v14 = vrot.slane %v1455_v4, 1  ;;  %v426_v19 = vrot.slane %v1447_v63, 7  ;;  %v427_v20 = vrot.slane %v1455_v4, 7 }
  0x64   : > { %336 = vrot.lane.b32.xlu0 %v333_v35, %s1147_s25  ;;  %v1399_v36 = vmax.f32 %v312_v33, %v332_v34  ;;  %v448_v24 = vrot.slane %v1447_v63, 2  ;;  %v449_v25 = vrot.slane %v1455_v4, 2  ;;  %v442_v28 = vrot.slane %v1447_v63, 6 }
  0x65   : > { %v435_v23 = vsel %vm302_vm2, %v433_v14, %v432_v13  ;;  %v428_v27 = vsel %vm293_vm0, %v426_v19, %v427_v20  ;;  %v443_v31 = vrot.slane %v1455_v4, 6  ;;  %v429_v32 = vsel %vm293_vm0, %v427_v20, %v426_v19 }
  0x66   : > { %v437_v30 = vsel %vm306_vm6, %v435_v23, 0.0  ;;  %v451_v33 = vsel %vm324_vm5, %v449_v25, %v448_v24  ;;  %v434_v34 = vsel %vm302_vm2, %v432_v13, %v433_v14 }
  0x68   : > { %339 = vrot.lane.b32.xlu0 %v1399_v36, %s1147_s25 }
  0xd6   : > { %v337_v37 = vpop.permute.xlu0 %336 }
  0xd7   : > { %v338_v38 = vsel %vm335_vm8, %v337_v37, %v333_v35 }
  0xd8   : > { %342 = vrot.lane.b32.xlu1 %v338_v38, %s1147_s25 }
  0xda   : > { %v340_v39 = vpop.permute.xlu0 %339 }
  0xdb   : > { %v341_v40 = vsel %vm335_vm8, %v340_v39, %v1399_v36 }
  0xdc   : > { %344 = vrot.lane.b32.xlu1 %v341_v40, %s1147_s25 }
 0x14a   : > { %v343_v41 = vpop.permute.xlu1 %342 }
 0x14b   : > { %v346_v42 = vsel %vm335_vm8, %v343_v41, %v333_v35  ;;  %v439_v41 = vmax.f32 %v428_v27, %v437_v30 }
 0x14c   : > { %351 = vrot.lane.b32.xlu0 %v346_v42, %s1148_s23 }
 0x14e   : > { %v345_v44 = vpop.permute.xlu1 %344 }
 0x14f   : > { %v347_v45 = vsel %vm335_vm8, %v345_v44, %v1399_v36 }
 0x150   : > { %360 = vrot.lane.b32.xlu0 %v346_v42, %s1149_s14  ;;  %353 = vrot.lane.b32.xlu1 %v347_v45, %s1148_s23 }
 0x154   : > { %373 = vrot.lane.b32.xlu0 %v346_v42, %s1150_s7  ;;  %362 = vrot.lane.b32.xlu1 %v347_v45, %s1149_s14 }
 0x158   : > { %382 = vrot.lane.b32.xlu0 %v346_v42, %s1151_s6  ;;  %375 = vrot.lane.b32.xlu1 %v347_v45, %s1150_s7  ;;  %v430_v42 = vsel %vm296_vm1, %v429_v32, 0.0  ;;  %v1590_v32 = vld [vmem:[%s1350_s12 + $0x10] sm:$0xff] }
 0x159   : > { %v438_v55 = vmax.f32 %v430_v42, %v434_v34  ;;  %520 = vst.msk [vmem:[%s1575_s30] sm:$0xff] %vm402_vm9, %v1590_v32  ;;  %v288_v42 = vld [vmem:[%s1343_s8 + $0x48] sm:$0xff] }
 0x15a   : > { %848 = vst.msk [vmem:[%s1414_s9 + $0x18] sm:$0xff] %vm402_vm9, %v288_v42 }
 0x15c   : > { %384 = vrot.lane.b32.xlu1 %v347_v45, %s1151_s6 }
 0x1be   : > { %v352_v47 = vpop.permute.xlu0 %351 }
 0x1bf   : > { %v357_v54 = vsel %vm348_vm11, %v352_v47, 0.0 }
 0x1c2   : > { %v354_v49 = vpop.permute.xlu1 %353  ;;  %v361_v50 = vpop.permute.xlu0 %360 }
 0x1c3   : > { %v366_v51 = vsel %vm359_vm10, %v361_v50, 0.0  ;;  %v358_v0 = vsel %vm348_vm11, %v354_v49, 0.0 }
 0x1c4   : > { %v368_v57 = vmax.f32 %v357_v54, %v366_v51  ;;  %v453_v54 = vsel %vm328_vm7, %v451_v33, 0.0 }
 0x1c6   : > { %v363_v52 = vpop.permute.xlu1 %362  ;;  %v374_v53 = vpop.permute.xlu0 %373  ;;  %v370_v5 = vmax.f32 %v333_v35, %v368_v57 }
 0x1c7   : > { %v367_v60 = vsel %vm359_vm10, %v363_v52, 0.0  ;;  %v379_v2 = vsel %vm372_vm12, %v374_v53, 0.0  ;;  %v444_v53 = vsel %vm315_vm3, %v442_v28, %v443_v31 }
 0x1c8   : > { %v369_v6 = vmax.f32 %v358_v0, %v367_v60  ;;  %v450_v0 = vsel %vm324_vm5, %v448_v24, %v449_v25 }
 0x1ca   : > { %v376_v61 = vpop.permute.xlu1 %375  ;;  %v383_v62 = vpop.permute.xlu0 %382  ;;  %v371_v15 = vmax.f32 %v1399_v36, %v369_v6  ;;  %v455_v6 = vmax.f32 %v444_v53, %v453_v54 }
 0x1cb   : > { %v388_v3 = vsel %vm381_vm13, %v383_v62, 0.0  ;;  %v380_v11 = vsel %vm372_vm12, %v376_v61, 0.0 }
 0x1cc   : > { %v390_v8 = vmax.f32 %v379_v2, %v388_v3 }
 0x1ce   : > { %v392_v9 = vmax.f32 %v370_v5, %v390_v8  ;;  %v385_v10 = vpop.permute.xlu1 %384  ;;  %v441_v5 = vmax.f32 %v1455_v4, %v439_v41  ;;  %v287_v41 = vld [vmem:[%s1343_s8 + $0x40] sm:$0xff] }
 0x1cf   : > { %v389_v12 = vsel %vm381_vm13, %v385_v10, 0.0  ;;  %847 = vst.msk [vmem:[%s1414_s9 + $0x10] sm:$0xff] %vm402_vm9, %v287_v41 }
 0x1d0   : > { %vm394_vm14 = vcmp.gt.f32.partialorder %v392_v9, 0.0  ;;  %v391_v16 = vmax.f32 %v380_v11, %v389_v12  ;;  %v440_v12 = vmax.f32 %v1447_v63, %v438_v55 }
 0x1d1   : > { %v845_v18 = vsel %vm394_vm14, 1.0, %v1152_v17 }
 0x1d2   : > { %v1467_v21 = vmul.f32 %v845_v18, %v281_v43  ;;  %v393_v22 = vmax.f32 %v371_v15, %v391_v16  ;;  %v1548_v15 = vmax.f32 %v441_v5, %v455_v6 }
 0x1d4   : > { %851 = vst.msk [vmem:[%s1414_s9 + $0x30] sm:$0xff] %vm402_vm9, %v1467_v21  ;;  %vm395_vm15 = vcmp.gt.f32.partialorder %v393_v22, 0.0  ;;  %v531_v35 = vrot.slane %v1467_v21, 7  ;;  %v539_v37 = vrot.slane %v1467_v21, 1  ;;  %v547_v45 = vrot.slane %v1467_v21, 6 }
 0x1d5   : > { %v846_v26 = vsel %vm395_vm15, 1.0, %v1152_v17  ;;  %v555_v50 = vrot.slane %v1467_v21, 2 }
 0x1d6   : > { %v1480_v29 = vmul.f32 %v846_v26, %v282_v46  ;;  %v445_v46 = vsel %vm315_vm3, %v443_v31, %v442_v28  ;;  %v1571_v26 = vld [vmem:[%s1350_s12 + $0x18] sm:$0xff] }
 0x1d7   : > { %v446_v62 = vsel %vm318_vm4, %v445_v46, 0.0  ;;  %521 = vst.msk [vmem:[%s1575_s30 + $0x8] sm:$0xff] %vm402_vm9, %v1571_v26 }
 0x1d8   : > { %852 = vst.msk [vmem:[%s1414_s9 + $0x38] sm:$0xff] %vm402_vm9, %v1480_v29  ;;  %v532_v36 = vrot.slane %v1480_v29, 7  ;;  %v540_v38 = vrot.slane %v1480_v29, 1  ;;  %v548_v39 = vrot.slane %v1480_v29, 6  ;;  %v556_v40 = vrot.slane %v1480_v29, 2 }
 0x1d9   : > { %v454_v13 = vmax.f32 %v446_v62, %v450_v0 }
 0x1da   : > { %v533_v43 = vsel %vm293_vm0, %v531_v35, %v532_v36  ;;  %v542_v44 = vsel %vm302_vm2, %v540_v38, %v539_v37  ;;  %v534_v51 = vsel %vm293_vm0, %v532_v36, %v531_v35  ;;  %v558_v57 = vsel %vm324_vm5, %v556_v40, %v555_v50  ;;  %v414_v35 = vld [vmem:[%s1350_s12] sm:$0xff]  ;;  %v415_v36 = vld [vmem:[%s1350_s12 + $0x8] sm:$0xff] }
 0x1db   : > { %v538_v47 = vadd.f32 %v533_v43, %v1480_v29  ;;  %v544_v49 = vsel %vm306_vm6, %v542_v44, 0.0  ;;  %v535_v52 = vsel %vm296_vm1, %v534_v51, 0.0  ;;  %v550_v59 = vsel %vm315_vm3, %v548_v39, %v547_v45  ;;  %857 = vst.msk [vmem:[%s1575_s30 + $0x20] sm:$0xff] %vm402_vm9, %v414_v35  ;;  %858 = vst.msk [vmem:[%s1575_s30 + $0x28] sm:$0xff] %vm402_vm9, %v415_v36 }
 0x1dc   : > { %v537_v58 = vadd.f32 %v535_v52, %v1467_v21  ;;  %v549_v60 = vsel %vm315_vm3, %v547_v45, %v548_v39  ;;  %v541_v61 = vsel %vm302_vm2, %v539_v37, %v540_v38  ;;  %v560_v8 = vsel %vm328_vm7, %v558_v57, 0.0  ;;  %v422_v37 = vld [vmem:[%s1350_s12 + $0x40] sm:$0xff]  ;;  %v423_v38 = vld [vmem:[%s1350_s12 + $0x48] sm:$0xff]  ;;  %s1153_s12 = smov [#allocation7]  }
 0x1dd   : > { %v546_v56 = vadd.f32 %v544_v49, %v538_v47  ;;  %v551_v9 = vsel %vm318_vm4, %v550_v59, 0.0  ;;  %v557_v14 = vsel %vm324_vm5, %v555_v50, %v556_v40  ;;  %v1552_v7 = vmax.f32 %v440_v12, %v454_v13  ;;  %855 = vst.msk [vmem:[%s1575_s30 + $0x10] sm:$0xff] %vm402_vm9, %v422_v37  ;;  %v279_v39 = vld [vmem:[%s1343_s8] sm:$0xff]  ;;  %v280_v40 = vld [vmem:[%s1343_s8 + $0x8] sm:$0xff]  ;;  %856 = vst.msk [vmem:[%s1575_s30 + $0x18] sm:$0xff] %vm402_vm9, %v423_v38  ;;  %s624_s8 = scalar_lea.sflag [#allocation4], %s1339_s10 }
 0x1de   : > { %v545_v3 = vadd.f32 %v541_v61, %v537_v58  ;;  %849 = vst.msk [vmem:[%s1414_s9 + $0x20] sm:$0xff] %vm402_vm9, %v279_v39  ;;  %850 = vst.msk [vmem:[%s1414_s9 + $0x28] sm:$0xff] %vm402_vm9, %v280_v40 }
 0x1df   : > { %v554_v2 = vadd.f32 %v549_v60, %v546_v56 }
 0x1e0   : > { %v553_v11 = vadd.f32 %v551_v9, %v545_v3 }
 0x1e1   : > { %v1539_v10 = vadd.f32 %v560_v8, %v554_v2 }
 0x1e2   : > { %v1546_v4 = vadd.f32 %v557_v14, %v553_v11 }
 0x1e3   : > { %566 = vrot.lane.b32.xlu1 %v1539_v10, %s1147_s25 }
 0x1e4   : > { %563 = vrot.lane.b32.xlu0 %v1546_v4, %s1147_s25 }
 0x1e7   : > { %461 = vrot.lane.b32.xlu1 %v1548_v15, %s1147_s25 }
 0x1e8   : > { %458 = vrot.lane.b32.xlu0 %v1552_v7, %s1147_s25 }
 0x255   : > { %v567_v1 = vpop.permute.xlu1 %566 }
 0x256   : > { %v568_v63 = vsel %vm335_vm8, %v567_v1, %v1539_v10  ;;  %v564_v16 = vpop.permute.xlu0 %563 }
 0x257   : > { %571 = vrot.lane.b32.xlu1 %v568_v63, %s1147_s25  ;;  %v565_v18 = vsel %vm335_vm8, %v564_v16, %v1546_v4 }
 0x258   : > { %569 = vrot.lane.b32.xlu0 %v565_v18, %s1147_s25 }
 0x259   : > { %v462_v19 = vpop.permute.xlu1 %461 }
 0x25a   : > { %v463_v20 = vsel %vm335_vm8, %v462_v19, %v1548_v15  ;;  %v459_v22 = vpop.permute.xlu0 %458 }
 0x25b   : > { %466 = vrot.lane.b32.xlu1 %v463_v20, %s1147_s25  ;;  %v460_v23 = vsel %vm335_vm8, %v459_v22, %v1552_v7 }
 0x25c   : > { %464 = vrot.lane.b32.xlu0 %v460_v23, %s1147_s25  ;;  %s1015_s25 = sshll.u32 %s1153_s12, 4  ;;  %s1016_s25 = int_to_ptr.vmem [resolvable:$false] %s1015_s25 }
 0x25d   : > { %s1017_s22 = scalar_lea.vmem %s1016_s25, 2048  ;;  %p1018_p5 = scmp.lt.s32.totalorder %s1642_s29, %s1016_s25 }
 0x25e   : > { %p1019_p7 = scmp.lt.s32.totalorder %s1017_s22, %s1011_s28 }
 0x260   : > { %p1020_p9 = por %p1019_p7, %p1018_p5 }
 0x262   : > { %p1021_p11 = pnand %p1020_p9, %p1014_p10 }
 0x2c9   : > { %v572_v24 = vpop.permute.xlu1 %571 }
 0x2ca   : > { %v570_v25 = vpop.permute.xlu0 %569  ;;  %v574_v33 = vsel %vm335_vm8, %v572_v24, %v1539_v10 }
 0x2cb   : > { %v573_v34 = vsel %vm335_vm8, %v570_v25, %v1546_v4 }
 0x2cd   : > { %v467_v27 = vpop.permute.xlu1 %466 }
 0x2ce   : > { %v469_v28 = vsel %vm335_vm8, %v467_v27, %v1548_v15  ;;  %v465_v30 = vpop.permute.xlu0 %464 }
 0x2cf   : > { %474 = vrot.lane.b32.xlu1 %v469_v28, %s1148_s23  ;;  %v468_v31 = vsel %vm335_vm8, %v465_v30, %v1552_v7 }
 0x2d0   : > { %472 = vrot.lane.b32.xlu0 %v468_v31, %s1148_s23 }
 0x2d3   : > { %482 = vrot.lane.b32.xlu1 %v469_v28, %s1149_s14 }
 0x2d4   : > { %480 = vrot.lane.b32.xlu0 %v468_v31, %s1149_s14 }
 0x2d7   : > { %494 = vrot.lane.b32.xlu1 %v469_v28, %s1150_s7 }
 0x2d8   : > { %492 = vrot.lane.b32.xlu0 %v468_v31, %s1150_s7 }
 0x2db   : > { %502 = vrot.lane.b32.xlu1 %v469_v28, %s1151_s6 }
 0x2dc   : > { %500 = vrot.lane.b32.xlu0 %v468_v31, %s1151_s6 }
 0x2df   : > { %579 = vrot.lane.b32.xlu1 %v574_v33, %s1148_s23 }
 0x2e0   : > { %577 = vrot.lane.b32.xlu0 %v573_v34, %s1148_s23 }
 0x2e3   : > { %589 = vrot.lane.b32.xlu1 %v574_v33, %s1149_s14 }
 0x2e4   : > { %587 = vrot.lane.b32.xlu0 %v573_v34, %s1149_s14 }
 0x2e7   : > { %599 = vrot.lane.b32.xlu1 %v574_v33, %s1150_s7 }
 0x2e8   : > { %597 = vrot.lane.b32.xlu0 %v573_v34, %s1150_s7 }
 0x2eb   : > { %609 = vrot.lane.b32.xlu1 %v574_v33, %s1151_s6 }
 0x2ec   : > { %607 = vrot.lane.b32.xlu0 %v573_v34, %s1151_s6 }
 0x2ed   : > { %1024 = shalt.err (!%p1021_p11)
}
 0x2ee   : > { %s1025_s23 = scalar_lea.hbm %s1639_s5, 1024  ;;  %s1029_s7 = scalar_lea.hbm %s1814_s2, 2048 }
 0x2ef   : > { %p1026_p3 = scmp.ne.s32.totalorder %s1639_s5, %s1025_s23  ;;  %p1030_p2 = scmp.lt.u32.totalorder %s1639_s5, %s1814_s2 }
 0x2f0   : > { %p1031_p4 = scmp.lt.u32.totalorder %s1029_s7, %s1025_s23  ;;  %p1033_p13 = scmp.lt.u32.totalorder %s1025_s23, %s1639_s5 }
 0x2f1   : > { %p1027_p8 = pnand %p1026_p3, %p1826_p1 }
 0x2f2   : > { %p1032_p6 = por %p1031_p4, %p1030_p2 }
 0x2f3   : > { %p1028_p0 = pneg %p1027_p8 }
 0x2f4   : > { %p1034_p12 = por %p1033_p13, %p1032_p6 }
 0x2f6   : > { %p1035_p10 = pnand %p1034_p12, %p1028_p0 }
 0x2f8   : > { %1038 = shalt.err (!%p1035_p10)
}
 0x2f9   : > { %s1154_s20 = smov 128   ;;  %s1155_s28 = smov 8  }
 0x2fa   : > { %884 = dma.vmem_to_hbm [thread:$0]  (%p1826_p1), %s1642_s29, 1024, %s1639_s5, %s624_s8, %s1154_s20, %s1154_s20, %s1155_s28  }
 0x2fb   : > { %s628_s5 = sand.u32 1, %s1204_s19   ;;  %s663_s29 = sshll.u32 %s1575_s30, 4  ;;  %s1707_s29 = int_to_ptr.vmem [resolvable:$true] %s663_s29 }
 0x2fc   : > { %s1705_s25 = scalar_lea.hbm %s1815_s3, %s872_s13  ;;  %s1720_s13 = scalar_lea.sflag [#allocation9], %s628_s5 }
 0x2fd   : > { %s1039_s22 = scalar_lea.vmem %s1707_s29, 1024  ;;  %s1156_s23 = smov [#allocation8]  }
 0x2fe   : > { %p1040_p5 = scmp.ne.s32.totalorder %s1707_s29, %s1039_s22  ;;  %s1043_s9 = sshll.u32 %s1156_s23, 4  ;;  %s1044_s9 = int_to_ptr.vmem [resolvable:$false] %s1043_s9 }
 0x2ff   : > { %p1046_p11 = scmp.lt.s32.totalorder %s1707_s29, %s1044_s9 }
 0x300   : > { %p1041_p7 = pnand %p1040_p5, %p1826_p1 }
 0x302   : > { %p1042_p9 = pneg %p1041_p7 }
 0x341   : > { %v475_v43 = vpop.permute.xlu1 %474 }
 0x342   : > { %v473_v44 = vpop.permute.xlu0 %472  ;;  %v479_v50 = vsel %vm348_vm11, %v475_v43, 0.0 }
 0x343   : > { %v478_v54 = vsel %vm348_vm11, %v473_v44, 0.0 }
 0x345   : > { %v483_v45 = vpop.permute.xlu1 %482 }
 0x346   : > { %v481_v46 = vpop.permute.xlu0 %480  ;;  %v487_v47 = vsel %vm359_vm10, %v483_v45, 0.0 }
 0x347   : > { %v486_v51 = vsel %vm359_vm10, %v481_v46, 0.0  ;;  %v489_v52 = vmax.f32 %v479_v50, %v487_v47 }
 0x348   : > { %v488_v55 = vmax.f32 %v478_v54, %v486_v51 }
 0x349   : > { %v495_v49 = vpop.permute.xlu1 %494  ;;  %v491_v59 = vmax.f32 %v1548_v15, %v489_v52 }
 0x34a   : > { %v493_v53 = vpop.permute.xlu0 %492  ;;  %v499_v57 = vsel %vm372_vm12, %v495_v49, 0.0  ;;  %v490_v2 = vmax.f32 %v1552_v7, %v488_v55 }
 0x34b   : > { %v498_v62 = vsel %vm372_vm12, %v493_v53, 0.0 }
 0x34d   : > { %v503_v56 = vpop.permute.xlu1 %502 }
 0x34e   : > { %v507_v58 = vsel %vm381_vm13, %v503_v56, 0.0  ;;  %v501_v61 = vpop.permute.xlu0 %500 }
 0x34f   : > { %v509_v60 = vmax.f32 %v499_v57, %v507_v58  ;;  %v506_v0 = vsel %vm381_vm13, %v501_v61, 0.0 }
 0x350   : > { %v508_v5 = vmax.f32 %v498_v62, %v506_v0 }
 0x351   : > { %v511_v3 = vmax.f32 %v491_v59, %v509_v60  ;;  %v580_v6 = vpop.permute.xlu1 %579 }
 0x352   : > { %v510_v8 = vmax.f32 %v490_v2, %v508_v5  ;;  %v578_v9 = vpop.permute.xlu0 %577  ;;  %v584_v15 = vsel %vm348_vm11, %v580_v6, 0.0 }
 0x353   : > { %vm513_vm0 = vcmp.gt.f32.partialorder %v511_v3, 0.0  ;;  %v586_v16 = vadd.f32 %v584_v15, %v1539_v10 }
 0x354   : > { %v854_v11 = vsel %vm513_vm0, 1.0, %v1152_v17  ;;  %vm512_vm1 = vcmp.gt.f32.partialorder %v510_v8, 0.0 }
 0x355   : > { %v519_v12 = vmul.f32 %v854_v11, %v1571_v26  ;;  %v590_v13 = vpop.permute.xlu1 %589  ;;  %v853_v14 = vsel %vm512_vm1, 1.0, %v1152_v17  ;;  %v583_v17 = vsel %vm348_vm11, %v578_v9, 0.0 }
 0x356   : > { %v518_v7 = vmul.f32 %v853_v14, %v1590_v32  ;;  %v588_v1 = vpop.permute.xlu0 %587  ;;  %v594_v63 = vsel %vm359_vm10, %v590_v13, 0.0 }
 0x357   : > { %860 = vst.msk [vmem:[%s1575_s30 + $0x38] sm:$0xff] %vm402_vm9, %v519_v12  ;;  %v593_v19 = vsel %vm359_vm10, %v588_v1, 0.0 }
 0x358   : > { %859 = vst.msk [vmem:[%s1575_s30 + $0x30] sm:$0xff] %vm402_vm9, %v518_v7  ;;  %s1045_s30 = scalar_lea.vmem %s1044_s9, 2048 }
 0x359   : > { %v600_v18 = vpop.permute.xlu1 %599  ;;  %p1047_p3 = scmp.lt.s32.totalorder %s1045_s30, %s1039_s22 }
 0x35a   : > { %v604_v20 = vsel %vm372_vm12, %v600_v18, 0.0 }
 0x35b   : > { %p1048_p8 = por %p1047_p3, %p1046_p11 }
 0x35d   : > { %p1049_p0 = pnand %p1048_p8, %p1042_p9 }
 0x35f   : > { %1052 = shalt.err (!%p1049_p0)
}
 0x360   : > { %s1053_s14 = scalar_lea.hbm %s1705_s25, 1024  ;;  %s1057_s11 = scalar_lea.hbm %s1815_s3, 2048 }
 0x361   : > { %p1054_p2 = scmp.ne.s32.totalorder %s1705_s25, %s1053_s14  ;;  %p1058_p13 = scmp.lt.u32.totalorder %s1705_s25, %s1815_s3 }
 0x362   : > { %p1059_p12 = scmp.lt.u32.totalorder %s1057_s11, %s1053_s14  ;;  %p1061_p5 = scmp.lt.u32.totalorder %s1053_s14, %s1705_s25 }
 0x363   : > { %p1055_p4 = pnand %p1054_p2, %p1826_p1 }
 0x364   : > { %p1060_p10 = por %p1059_p12, %p1058_p13 }
 0x365   : > { %p1056_p6 = pneg %p1055_p4 }
 0x366   : > { %p1062_p7 = por %p1061_p5, %p1060_p10 }
 0x368   : > { %p1063_p9 = pnand %p1062_p7, %p1056_p6 }
 0x36a   : > { %1066 = shalt.err (!%p1063_p9)
}
 0x36b   : > { %885 = dma.vmem_to_hbm [thread:$0]  (%p1826_p1), %s1707_s29, 1024, %s1705_s25, %s1720_s13, %s1154_s20, %s1154_s20, %s1155_s28   ;;  %v585_v10 = vadd.f32 %v583_v17, %v1546_v4  ;;  %v596_v22 = vadd.f32 %v594_v63, %v586_v16  ;;  %v598_v23 = vpop.permute.xlu0 %597  ;;  %v610_v27 = vpop.permute.xlu1 %609 }
 0x36c   : > { %v603_v24 = vsel %vm372_vm12, %v598_v23, 0.0  ;;  %s844_s12 = sshll.u32 %s1339_s10, 4  ;;  %v614_v28 = vsel %vm381_vm13, %v610_v27, 0.0  ;;  %s874_s22 = sshll.u32 %s1204_s19, 8 }
 0x36d   : > { %v595_v25 = vadd.f32 %v593_v19, %v585_v10  ;;  %v606_v26 = vadd.f32 %v604_v20, %v596_v22  ;;  %s273_s29 = scalar_lea.vmem [#allocation10], %s844_s12  ;;  %s1764_s9 = scalar_lea.hbm %s1816_s4, %s874_s22 }
 0x36e   : > { %s679_s25 = sshll.u32 %s273_s29, 4  ;;  %s1157_s30 = smov [#allocation10]   ;;  %s1757_s25 = int_to_ptr.vmem [resolvable:$true] %s679_s25 }
 0x36f   : > { %v605_v30 = vadd.f32 %v603_v24, %v595_v25  ;;  %v616_v31 = vadd.f32 %v614_v28, %v606_v26  ;;  %v608_v32 = vpop.permute.xlu0 %607  ;;  %s1067_s19 = scalar_lea.vmem %s1757_s25, 256  ;;  %s1071_s14 = sshll.u32 %s1157_s30, 4  ;;  %s1072_s14 = int_to_ptr.vmem [resolvable:$false] %s1071_s14 }
 0x370   : > { %v613_v4 = vsel %vm381_vm13, %v608_v32, 0.0  ;;  %p1068_p11 = scmp.ne.s32.totalorder %s1757_s25, %s1067_s19  ;;  %s1073_s7 = scalar_lea.vmem %s1072_s14, 512 }
 0x371   : > { %v618_v33 = vmul.f32 0.04, %v616_v31  ;;  %v615_v34 = vadd.f32 %v613_v4, %v605_v30  ;;  %p1074_p0 = scmp.lt.s32.totalorder %s1757_s25, %s1072_s14  ;;  %p1075_p2 = scmp.lt.s32.totalorder %s1073_s7, %s1067_s19 }
 0x372   : > { %p1069_p3 = pnand %p1068_p11, %p1826_p1 }
 0x373   : > { %v620_v35 = vmul.f32 %v618_v33, %v1480_v29  ;;  %v617_v36 = vmul.f32 0.04, %v615_v34  ;;  %p1076_p4 = por %p1075_p2, %p1074_p0 }
 0x374   : > { %p1070_p8 = pneg %p1069_p3 }
 0x375   : > { %622 = vst.msk [vmem:[%s273_s29 + $0x8] sm:$0xff] %vm402_vm9, %v620_v35  ;;  %v619_v37 = vmul.f32 %v617_v36, %v1467_v21 }
 0x376   : > { %p1077_p6 = pnand %p1076_p4, %p1070_p8 }
 0x377   : > { %621 = vst.msk [vmem:[%s273_s29] sm:$0xff] %vm402_vm9, %v619_v37 }
 0x378   : > { %1080 = shalt.err (!%p1077_p6)
}
 0x379   : > { %s1081_s6 = scalar_lea.hbm %s1764_s9, 256  ;;  %s1085_s8 = scalar_lea.hbm %s1816_s4, 512 }
 0x37a   : > { %p1082_p13 = scmp.ne.s32.totalorder %s1764_s9, %s1081_s6  ;;  %p1086_p5 = scmp.lt.u32.totalorder %s1764_s9, %s1816_s4 }
 0x37b   : > { %p1087_p7 = scmp.lt.u32.totalorder %s1085_s8, %s1081_s6  ;;  %p1089_p11 = scmp.lt.u32.totalorder %s1081_s6, %s1764_s9 }
 0x37c   : > { %p1083_p12 = pnand %p1082_p13, %p1826_p1 }
 0x37d   : > { %p1088_p9 = por %p1087_p7, %p1086_p5 }
 0x37e   : > { %p1084_p10 = pneg %p1083_p12 }
 0x37f   : > { %p1090_p3 = por %p1089_p11, %p1088_p9 }
 0x381   : > { %p1091_p8 = pnand %p1090_p3, %p1084_p10 }
 0x383   : > { %1094 = shalt.err (!%p1091_p8)
}
 0x384   : > { %886 = dma.vmem_to_hbm [thread:$0]  (%p1826_p1), %s1757_s25, 256, %s1764_s9, %s1720_s13, %s1154_s20, %s1154_s20, %s1155_s28  }
 0x385 PF: > { %s694_s22 = sand.u32 1, %s1129_s15   ;;  %p1827_p0 = scmp.ne.s32.totalorder %s1822_s27, 0 }
 0x386   : > { %p1828_p2 = scmp.ge.s32.totalorder %s1141_s18, 2  ;;  %s695_s10 = scalar_lea.sflag [#allocation4], %s694_s22 }
 0x388   : > { %p898_p4 = pnand %p1828_p2, %p1827_p0 }
 0x38a   : > { %1120 = dma.done.wait (!%p898_p4), %s695_s10, 1024  }
 0x38b   : > { %1122 = vsyncadd (!%p898_p4), %s695_s10, 4294966272  ;;  %s1829_s26 = sadd.s32 4294967294, %s1141_s18  }
 0x38c   : > { %s703_s23 = sand.u32 1, %s1829_s26  }
 0x38d   : > { %s704_s19 = scalar_lea.sflag [#allocation9], %s703_s23 }
 0x38e   : > { %1124 = dma.done.wait (!%p898_p4), %s704_s19, 1280  }
 0x38f   : > { %1126 = vsyncadd (!%p898_p4), %s704_s19, 4294966016  ;;  %p24_p1 = scmp.ge.s32.totalorder %s1208_s21, 4   ;;  %s1830_s15 = smov %s1133_s16 }
 0x390   : > { %s1831_s16 = smov %s1137_s17  ;;  %s1832_s17 = smov %s1220_s24 }
 0x391   : > { %s1833_s18 = smov %s1208_s21  ;;  %26 = sbr.rel (!%p24_p1) target bundleno = 9 (0x9), region = 124 }
 0x398   :  { %718 = vsyncpa [#allocation3], 1 }
 0x399   :  { %720 = vsyncpa [#allocation3 + $0x1], 1 }
 0x39a   :  { %721 = vsyncpa [#allocation6], 1 }
 0x39b   :  { %723 = vsyncpa [#allocation6 + $0x1], 1 }
 0x39c   :  { %724 = vsyncpa [#allocation4], 1 }
 0x39d   :  { %726 = vsyncpa [#allocation4 + $0x1], 1 }
 0x39e   :  { %727 = vsyncpa [#allocation9], 1 }
 0x39f   :  { %729 = vsyncpa [#allocation9 + $0x1], 1 }

</bundles_post_ra>
